<compile_context>
chip_gen: v7x
topology: tpu7x:2x2x1
jax: 0.10.0
libtpu: 0.0.40
codegen_flags: <defaults>
</compile_context>

<pallas_src>
import numpy as np
import jax
import jax.numpy as jnp
from jax import lax
from jax.experimental import pallas as pl
from jax.experimental.pallas import tpu as pltpu

DILATION = 2  # every conv in SAM: k=3, stride=1, dilation=2


# --------------------------- weight preprocessing -----------------------------

def conv_to_hwio(w_oihw):
    return jnp.transpose(w_oihw, (2, 3, 1, 0))


def deconv_to_equiv_hwio(w_iohw):
    # ConvTranspose2d(k=3,s=1,p=1,d=2) == Conv2d(pad = d*(k-1)-p = 3, d=2)
    # with spatially flipped kernel and swapped in/out channels.
    return jnp.transpose(w_iohw[:, :, ::-1, ::-1], (2, 3, 0, 1))


def _unroll_weights(w_hwio, Wp, Wo, dilation=DILATION, dtype=jnp.bfloat16):
    """big[ky, wp*Cin+ci, w*Cout+co] = w[ky,kx,ci,co] where wp = w + kx*d.
    Built with a constant one-hot selector + einsum (no host loops over
    tracers)."""
    K, _, Cin, Cout = w_hwio.shape
    sel = np.zeros((K, Wp, Wo), np.float32)
    for kx in range(K):
        for wo in range(Wo):
            sel[kx, wo + kx * dilation, wo] = 1.0
    big = jnp.einsum('kpw,ykio->ypiwo', jnp.asarray(sel),
                     w_hwio.astype(jnp.float32))
    return big.reshape(K, Wp * Cin, Wo * Cout).astype(dtype)


def prepare_sam_pallas(params, H, W):
    """One-time preprocessing (per spatial size): bf16 unrolled weights,
    tiled f32 bias rows, PReLU scalars. Kept OUT of the jitted forward."""
    del H  # row-unrolled weights only depend on W
    brow = lambda b, Wo: jnp.tile(b.astype(jnp.float32), Wo)[None, :]
    w1 = conv_to_hwio(params['conv1_w'])             # Conv2d   (pad=1 view)
    w2 = deconv_to_equiv_hwio(params['deconv1_w'])   # Deconv   (pad=3)
    w3 = deconv_to_equiv_hwio(params['deconv2_w'])   # Deconv   (pad=3)
    w4 = conv_to_hwio(params['conv2_w'])             # Conv2d   (pad=1)
    w2u = _unroll_weights(w2, W + 4, W)              # (3, (W+4)*C, W*C)
    w4u = _unroll_weights(w4, W + 4, W)              # (3, (W+4)*C, W*C)
    return dict(
        w1=_unroll_weights(w1, W + 2, W - 2), b1=brow(params['conv1_b'], W - 2),
        w3=_unroll_weights(w3, W + 6, W + 2), b3=brow(params['deconv2_b'], W + 2),
        # stage-2 fusion: br1 + br2 in one matmul chain
        w24=jnp.concatenate([w2u, w4u], axis=1),     # (3, 2*(W+4)*C, W*C)
        b24=brow(params['deconv1_b'], W) + brow(params['conv2_b'], W),
        alphas=jnp.stack([params['prelu1_a'],
                          params['prelu2_a']]).astype(jnp.float32),
    )


# ------------------------------- fused kernel ---------------------------------

def _make_sam_kernel(H, W, C):
    d = DILATION
    # per-layer geometry: (padded width, out width, out height)
    Wp1, Wo1, Ho1 = W + 2, W - 2, H - 2   # conv1   (pad=1) on x
    Wp3, Wo3, Ho3 = W + 6, W + 2, H + 2   # deconv2 (pad=3) on x
    Wp2 = W + 4                           # stage-2 padded width (both branches)
    OFF = Wp2 * C                         # lane offset of the z half in t_ref

    def kernel(x_ref, w1_ref, b1_ref, w3_ref, b3_ref, w24_ref, b24_ref,
               alpha_ref, o_ref, xp_ref, t_ref):
        x = x_ref[0]                                           # (H, W*C) f32

        # x padded by 3 (channel-fastest layout => W-padding is contiguous
        # columns); the pad-by-1 view needed by conv1 is an interior slice.
        xp_ref[...] = jnp.zeros_like(xp_ref)
        xp_ref[3:3 + H, 3 * C:(3 + W) * C] = x

        def conv(src_ref, r0, c0, ncols, Ho, w_ref, b_ref):
            # 3 MXU matmuls (bf16 in, f32 accumulate) over dilated row taps.
            acc = jnp.zeros((Ho, w_ref.shape[-1]), jnp.float32)
            for ky in range(3):
                lhs = src_ref[r0 + ky * d: r0 + ky * d + Ho,
                              c0: c0 + ncols].astype(jnp.bfloat16)
                acc = acc + jnp.dot(lhs, w_ref[ky],
                                    preferred_element_type=jnp.float32)
            return acc + b_ref[...]                            # + bias (f32)

        def prelu(v, a):
            return jnp.where(v >= 0, v, a * v)

        # ---- stage 1: both "first" convs read the padded x ----
        y = prelu(conv(xp_ref, 2, 2 * C, Wp1 * C, Ho1, w1_ref, b1_ref),
                  alpha_ref[0])                                # (H-2, (W-2)*C)
        z = prelu(conv(xp_ref, 0, 0, Wp3 * C, Ho3, w3_ref, b3_ref),
                  alpha_ref[1])                                # (H+2, (W+2)*C)

        # ---- stage 2: y (pad 3) and z (pad 1) side-by-side, one matmul set ----
        t_ref[...] = jnp.zeros_like(t_ref)
        t_ref[3:3 + Ho1, 3 * C:(3 + Wo1) * C] = y              # left half
        t_ref[1:1 + Ho3, OFF + C:OFF + (1 + Wo3) * C] = z      # right half
        br = conv(t_ref, 0, 0, 2 * OFF, H, w24_ref, b24_ref)   # = br1 + br2

        # fused residual (lane-dense W*C store at the test shape)
        o_ref[0] = (br + x).astype(o_ref.dtype)

    return kernel


@jax.jit
def sam_forward_pallas(x_nchw, prep):
    B, C, H, W = x_nchw.shape
    x = jnp.transpose(x_nchw, (0, 2, 3, 1)).reshape(B, H, W * C)  # NCHW -> row image
    kernel = _make_sam_kernel(H, W, C)

    def full(a):  # whole-array block, constant index map
        nd = a.ndim
        return pl.BlockSpec(a.shape, lambda b, _nd=nd: (0,) * _nd)

    out = pl.pallas_call(
        kernel,
        out_shape=jax.ShapeDtypeStruct((B, H, W * C), jnp.float32),
        grid=(B,),
        in_specs=[
            pl.BlockSpec((1, H, W * C), lambda b: (b, 0, 0)),      # x (per image)
            full(prep['w1']), full(prep['b1']),
            full(prep['w3']), full(prep['b3']),
            full(prep['w24']), full(prep['b24']),
            pl.BlockSpec(memory_space=pltpu.MemorySpace.SMEM),      # PReLU alphas
        ],
        out_specs=pl.BlockSpec((1, H, W * C), lambda b: (b, 0, 0)),
        scratch_shapes=[
            pltpu.VMEM((H + 6, (W + 6) * C), jnp.float32),          # x  padded by 3
            pltpu.VMEM((H + 4, 2 * (W + 4) * C), jnp.float32),      # [y pad 3 | z pad 1]
        ],
        compiler_params=pltpu.CompilerParams(
            dimension_semantics=("parallel",)),                     # megacore on v7x
    )(x, prep['w1'], prep['b1'], prep['w3'], prep['b3'],
      prep['w24'], prep['b24'], prep['alphas'])

    return jnp.transpose(out.reshape(B, H, W, C), (0, 3, 1, 2))     # NHWC -> NCHW


# --------------- parameter init (matches nn.Module shapes) --------------------

def init_sam_params(key, num_feat):
    C = num_feat
    ks = jax.random.split(key, 8)
    w = lambda k: jax.random.normal(k, (C, C, 3, 3), jnp.float32) * 0.1
    b = lambda k: jax.random.normal(k, (C,), jnp.float32) * 0.05
    return dict(
        conv1_w=w(ks[0]), conv1_b=b(ks[1]),      # nn.Conv2d          (out,in,3,3)
        deconv1_w=w(ks[2]), deconv1_b=b(ks[3]),  # nn.ConvTranspose2d (in,out,3,3)
        deconv2_w=w(ks[4]), deconv2_b=b(ks[5]),  # nn.ConvTranspose2d (in,out,3,3)
        conv2_w=w(ks[6]), conv2_b=b(ks[7]),      # nn.Conv2d          (out,in,3,3)
        prelu1_a=jnp.float32(0.25),              # nn.PReLU default
        prelu2_a=jnp.float32(0.25),
    )


# ---------------- pure-JAX reference (lax convs) for validation ---------------

def sam_forward_ref(x_nchw, p):
    dn = ('NHWC', 'HWIO', 'NHWC')

    def conv(x, w_hwio, b, pad):
        y = lax.conv_general_dilated(
            x, w_hwio, (1, 1), [(pad, pad), (pad, pad)],
            rhs_dilation=(2, 2), dimension_numbers=dn,
            precision=lax.Precision.HIGHEST)
        return y + b[None, None, None, :]

    prelu = lambda v, a: jnp.where(v >= 0, v, a * v)
    x = jnp.transpose(x_nchw, (0, 2, 3, 1))
    y = prelu(conv(x, conv_to_hwio(p['conv1_w']), p['conv1_b'], 1), p['prelu1_a'])
    br1 = conv(y, deconv_to_equiv_hwio(p['deconv1_w']), p['deconv1_b'], 3)
    z = prelu(conv(x, deconv_to_equiv_hwio(p['deconv2_w']), p['deconv2_b'], 3),
              p['prelu2_a'])
    br2 = conv(z, conv_to_hwio(p['conv2_w']), p['conv2_b'], 1)
    return jnp.transpose(br1 + br2 + x, (0, 3, 1, 2))


if __name__ == "__main__":
    B, C, H, W = 2, 8, 16, 16
    key = jax.random.PRNGKey(0)
    kx, kp = jax.random.split(key)
    x = jax.random.normal(kx, (B, C, H, W), jnp.float32)
    params = init_sam_params(kp, C)

    prep = prepare_sam_pallas(params, H, W)           # one-time weight unroll
    out = jax.block_until_ready(sam_forward_pallas(x, prep))
    ref = jax.block_until_ready(sam_forward_ref(x, params))

    assert out.shape == (B, C, H, W), out.shape
    np.testing.assert_allclose(np.asarray(out), np.asarray(ref),
                               rtol=2e-2, atol=3e-2)
    print("KERNEL_OK")
</pallas_src>

<mosaic_0001>
module attributes {stable_mosaic.version = 11 : i64} {
  func.func @kernel(%arg0: i32, %arg1: memref<1x16x128xf32, #tpu.memory_space<vmem>>, %arg2: memref<3x144x112xbf16, #tpu.memory_space<vmem>>, %arg3: memref<1x112xf32, #tpu.memory_space<vmem>>, %arg4: memref<3x176x144xbf16, #tpu.memory_space<vmem>>, %arg5: memref<1x144xf32, #tpu.memory_space<vmem>>, %arg6: memref<3x320x128xbf16, #tpu.memory_space<vmem>>, %arg7: memref<1x128xf32, #tpu.memory_space<vmem>>, %arg8: memref<2xf32, #tpu.memory_space<smem>>, %arg9: memref<1x16x128xf32, #tpu.memory_space<vmem>>, %arg10: memref<22x176xf32, #tpu.memory_space<vmem>>, %arg11: memref<20x320xf32, #tpu.memory_space<vmem>>) attributes {dimension_semantics = [#tpu.dimension_semantics<parallel>], iteration_bounds = array<i64: 2>, scalar_prefetch = 0 : i64, scratch_operands = 2 : i64, tpu.core_type = #tpu.core_type<tc>, window_params = [{transform_indices = @transform_0, window_bounds = array<i64: 1, 16, 128>}, {pipeline_mode = #tpu.pipeline_mode<synchronous>, transform_indices = @transform_1, window_bounds = array<i64: 3, 144, 112>}, {pipeline_mode = #tpu.pipeline_mode<synchronous>, transform_indices = @transform_2, window_bounds = array<i64: 1, 112>}, {pipeline_mode = #tpu.pipeline_mode<synchronous>, transform_indices = @transform_3, window_bounds = array<i64: 3, 176, 144>}, {pipeline_mode = #tpu.pipeline_mode<synchronous>, transform_indices = @transform_4, window_bounds = array<i64: 1, 144>}, {pipeline_mode = #tpu.pipeline_mode<synchronous>, transform_indices = @transform_5, window_bounds = array<i64: 3, 320, 128>}, {pipeline_mode = #tpu.pipeline_mode<synchronous>, transform_indices = @transform_6, window_bounds = array<i64: 1, 128>}, {transform_indices = @transform_7, window_bounds = array<i64: 2>}, {transform_indices = @transform_8, window_bounds = array<i64: 1, 16, 128>}]} {
    %c0 = arith.constant 0 : index
    %c0_0 = arith.constant 0 : index
    %c0_1 = arith.constant 0 : index
    %0 = vector.load %arg1[%c0, %c0_0, %c0_1] : memref<1x16x128xf32, #tpu.memory_space<vmem>>, vector<1x16x128xf32>
    %1 = vector.shape_cast %0 : vector<1x16x128xf32> to vector<16x128xf32>
    %cst = arith.constant 0.000000e+00 : f32
    %2 = vector.broadcast %cst : f32 to vector<22x176xf32>
    %c0_2 = arith.constant 0 : index
    %c0_3 = arith.constant 0 : index
    %3 = vector.load %arg10[%c0_2, %c0_3] : memref<22x176xf32, #tpu.memory_space<vmem>>, vector<22x176xf32>
    tpu.vector_store %arg10[%c0_2, %c0_3], %2 {strides = array<i32>} : memref<22x176xf32, #tpu.memory_space<vmem>>, vector<22x176xf32>,
    %c3 = arith.constant 3 : index
    %c24 = arith.constant 24 : index
    %4 = vector.load %arg10[%c3, %c24] : memref<22x176xf32, #tpu.memory_space<vmem>>, vector<16x128xf32>
    tpu.vector_store %arg10[%c3, %c24], %1 {strides = array<i32>} : memref<22x176xf32, #tpu.memory_space<vmem>>, vector<16x128xf32>,
    %cst_4 = arith.constant 0.000000e+00 : f32
    %5 = vector.broadcast %cst_4 : f32 to vector<14x112xf32>
    %c2 = arith.constant 2 : index
    %c16 = arith.constant 16 : index
    %6 = vector.load %arg10[%c2, %c16] : memref<22x176xf32, #tpu.memory_space<vmem>>, vector<14x144xf32>
    %7 = arith.truncf %6 : vector<14x144xf32> to vector<14x144xbf16>
    %c0_5 = arith.constant 0 : index
    %c0_6 = arith.constant 0 : index
    %c0_7 = arith.constant 0 : index
    %8 = vector.load %arg2[%c0_5, %c0_6, %c0_7] : memref<3x144x112xbf16, #tpu.memory_space<vmem>>, vector<1x144x112xbf16>
    %9 = vector.shape_cast %8 : vector<1x144x112xbf16> to vector<144x112xbf16>
    %cst_8 = arith.constant dense<0.000000e+00> : vector<14x112xf32>
    %10 = tpu.matmul %7, %9, %cst_8 {dimension_numbers = #tpu.dot_dimension_numbers<[1], [0], [0], [1], [0, 0, 1, 1], [], []>} : vector<14x144xbf16>, vector<144x112xbf16>, vector<14x112xf32> -> vector<14x112xf32>
    %11 = arith.addf %5, %10 : vector<14x112xf32>
    %c4 = arith.constant 4 : index
    %c16_9 = arith.constant 16 : index
    %12 = vector.load %arg10[%c4, %c16_9] : memref<22x176xf32, #tpu.memory_space<vmem>>, vector<14x144xf32>
    %13 = arith.truncf %12 : vector<14x144xf32> to vector<14x144xbf16>
    %c1 = arith.constant 1 : index
    %c0_10 = arith.constant 0 : index
    %c0_11 = arith.constant 0 : index
    %14 = vector.load %arg2[%c1, %c0_10, %c0_11] : memref<3x144x112xbf16, #tpu.memory_space<vmem>>, vector<1x144x112xbf16>
    %15 = vector.shape_cast %14 : vector<1x144x112xbf16> to vector<144x112xbf16>
    %cst_12 = arith.constant dense<0.000000e+00> : vector<14x112xf32>
    %16 = tpu.matmul %13, %15, %cst_12 {dimension_numbers = #tpu.dot_dimension_numbers<[1], [0], [0], [1], [0, 0, 1, 1], [], []>} : vector<14x144xbf16>, vector<144x112xbf16>, vector<14x112xf32> -> vector<14x112xf32>
    %17 = arith.addf %11, %16 : vector<14x112xf32>
    %c6 = arith.constant 6 : index
    %c16_13 = arith.constant 16 : index
    %18 = vector.load %arg10[%c6, %c16_13] : memref<22x176xf32, #tpu.memory_space<vmem>>, vector<14x144xf32>
    %19 = arith.truncf %18 : vector<14x144xf32> to vector<14x144xbf16>
    %c2_14 = arith.constant 2 : index
    %c0_15 = arith.constant 0 : index
    %c0_16 = arith.constant 0 : index
    %20 = vector.load %arg2[%c2_14, %c0_15, %c0_16] : memref<3x144x112xbf16, #tpu.memory_space<vmem>>, vector<1x144x112xbf16>
    %21 = vector.shape_cast %20 : vector<1x144x112xbf16> to vector<144x112xbf16>
    %cst_17 = arith.constant dense<0.000000e+00> : vector<14x112xf32>
    %22 = tpu.matmul %19, %21, %cst_17 {dimension_numbers = #tpu.dot_dimension_numbers<[1], [0], [0], [1], [0, 0, 1, 1], [], []>} : vector<14x144xbf16>, vector<144x112xbf16>, vector<14x112xf32> -> vector<14x112xf32>
    %23 = arith.addf %17, %22 : vector<14x112xf32>
    %c0_18 = arith.constant 0 : index
    %c0_19 = arith.constant 0 : index
    %24 = vector.load %arg3[%c0_18, %c0_19] : memref<1x112xf32, #tpu.memory_space<vmem>>, vector<1x112xf32>
    %25 = vector.broadcast %24 : vector<1x112xf32> to vector<14x112xf32>
    %26 = arith.addf %23, %25 : vector<14x112xf32>
    %c0_20 = arith.constant 0 : index
    %27 = memref.load %arg8[%c0_20] : memref<2xf32, #tpu.memory_space<smem>>
    %cst_21 = arith.constant 0.000000e+00 : f32
    %28 = vector.broadcast %cst_21 : f32 to vector<14x112xf32>
    %29 = arith.cmpf oge, %26, %28 : vector<14x112xf32>
    %30 = vector.broadcast %27 : f32 to vector<14x112xf32>
    %31 = arith.mulf %30, %26 : vector<14x112xf32>
    %32 = arith.select %29, %26, %31 : vector<14x112xi1>, vector<14x112xf32>
    %cst_22 = arith.constant 0.000000e+00 : f32
    %33 = vector.broadcast %cst_22 : f32 to vector<18x144xf32>
    %c0_23 = arith.constant 0 : index
    %c0_24 = arith.constant 0 : index
    %34 = vector.load %arg10[%c0_23, %c0_24] : memref<22x176xf32, #tpu.memory_space<vmem>>, vector<18x176xf32>
    %35 = arith.truncf %34 : vector<18x176xf32> to vector<18x176xbf16>
    %c0_25 = arith.constant 0 : index
    %c0_26 = arith.constant 0 : index
    %c0_27 = arith.constant 0 : index
    %36 = vector.load %arg4[%c0_25, %c0_26, %c0_27] : memref<3x176x144xbf16, #tpu.memory_space<vmem>>, vector<1x176x144xbf16>
    %37 = vector.shape_cast %36 : vector<1x176x144xbf16> to vector<176x144xbf16>
    %cst_28 = arith.constant dense<0.000000e+00> : vector<18x144xf32>
    %38 = tpu.matmul %35, %37, %cst_28 {dimension_numbers = #tpu.dot_dimension_numbers<[1], [0], [0], [1], [0, 0, 1, 1], [], []>} : vector<18x176xbf16>, vector<176x144xbf16>, vector<18x144xf32> -> vector<18x144xf32>
    %39 = arith.addf %33, %38 : vector<18x144xf32>
    %c2_29 = arith.constant 2 : index
    %c0_30 = arith.constant 0 : index
    %40 = vector.load %arg10[%c2_29, %c0_30] : memref<22x176xf32, #tpu.memory_space<vmem>>, vector<18x176xf32>
    %41 = arith.truncf %40 : vector<18x176xf32> to vector<18x176xbf16>
    %c1_31 = arith.constant 1 : index
    %c0_32 = arith.constant 0 : index
    %c0_33 = arith.constant 0 : index
    %42 = vector.load %arg4[%c1_31, %c0_32, %c0_33] : memref<3x176x144xbf16, #tpu.memory_space<vmem>>, vector<1x176x144xbf16>
    %43 = vector.shape_cast %42 : vector<1x176x144xbf16> to vector<176x144xbf16>
    %cst_34 = arith.constant dense<0.000000e+00> : vector<18x144xf32>
    %44 = tpu.matmul %41, %43, %cst_34 {dimension_numbers = #tpu.dot_dimension_numbers<[1], [0], [0], [1], [0, 0, 1, 1], [], []>} : vector<18x176xbf16>, vector<176x144xbf16>, vector<18x144xf32> -> vector<18x144xf32>
    %45 = arith.addf %39, %44 : vector<18x144xf32>
    %c4_35 = arith.constant 4 : index
    %c0_36 = arith.constant 0 : index
    %46 = vector.load %arg10[%c4_35, %c0_36] : memref<22x176xf32, #tpu.memory_space<vmem>>, vector<18x176xf32>
    %47 = arith.truncf %46 : vector<18x176xf32> to vector<18x176xbf16>
    %c2_37 = arith.constant 2 : index
    %c0_38 = arith.constant 0 : index
    %c0_39 = arith.constant 0 : index
    %48 = vector.load %arg4[%c2_37, %c0_38, %c0_39] : memref<3x176x144xbf16, #tpu.memory_space<vmem>>, vector<1x176x144xbf16>
    %49 = vector.shape_cast %48 : vector<1x176x144xbf16> to vector<176x144xbf16>
    %cst_40 = arith.constant dense<0.000000e+00> : vector<18x144xf32>
    %50 = tpu.matmul %47, %49, %cst_40 {dimension_numbers = #tpu.dot_dimension_numbers<[1], [0], [0], [1], [0, 0, 1, 1], [], []>} : vector<18x176xbf16>, vector<176x144xbf16>, vector<18x144xf32> -> vector<18x144xf32>
    %51 = arith.addf %45, %50 : vector<18x144xf32>
    %c0_41 = arith.constant 0 : index
    %c0_42 = arith.constant 0 : index
    %52 = vector.load %arg5[%c0_41, %c0_42] : memref<1x144xf32, #tpu.memory_space<vmem>>, vector<1x144xf32>
    %53 = vector.broadcast %52 : vector<1x144xf32> to vector<18x144xf32>
    %54 = arith.addf %51, %53 : vector<18x144xf32>
    %c1_43 = arith.constant 1 : index
    %55 = memref.load %arg8[%c1_43] : memref<2xf32, #tpu.memory_space<smem>>
    %cst_44 = arith.constant 0.000000e+00 : f32
    %56 = vector.broadcast %cst_44 : f32 to vector<18x144xf32>
    %57 = arith.cmpf oge, %54, %56 : vector<18x144xf32>
    %58 = vector.broadcast %55 : f32 to vector<18x144xf32>
    %59 = arith.mulf %58, %54 : vector<18x144xf32>
    %60 = arith.select %57, %54, %59 : vector<18x144xi1>, vector<18x144xf32>
    %cst_45 = arith.constant 0.000000e+00 : f32
    %61 = vector.broadcast %cst_45 : f32 to vector<20x320xf32>
    %c0_46 = arith.constant 0 : index
    %c0_47 = arith.constant 0 : index
    %62 = vector.load %arg11[%c0_46, %c0_47] : memref<20x320xf32, #tpu.memory_space<vmem>>, vector<20x320xf32>
    tpu.vector_store %arg11[%c0_46, %c0_47], %61 {strides = array<i32>} : memref<20x320xf32, #tpu.memory_space<vmem>>, vector<20x320xf32>,
    %c3_48 = arith.constant 3 : index
    %c24_49 = arith.constant 24 : index
    %63 = vector.load %arg11[%c3_48, %c24_49] : memref<20x320xf32, #tpu.memory_space<vmem>>, vector<14x112xf32>
    tpu.vector_store %arg11[%c3_48, %c24_49], %32 {strides = array<i32>} : memref<20x320xf32, #tpu.memory_space<vmem>>, vector<14x112xf32>,
    %c1_50 = arith.constant 1 : index
    %c168 = arith.constant 168 : index
    %64 = vector.load %arg11[%c1_50, %c168] : memref<20x320xf32, #tpu.memory_space<vmem>>, vector<18x144xf32>
    tpu.vector_store %arg11[%c1_50, %c168], %60 {strides = array<i32>} : memref<20x320xf32, #tpu.memory_space<vmem>>, vector<18x144xf32>,
    %cst_51 = arith.constant 0.000000e+00 : f32
    %65 = vector.broadcast %cst_51 : f32 to vector<16x128xf32>
    %c0_52 = arith.constant 0 : index
    %c0_53 = arith.constant 0 : index
    %66 = vector.load %arg11[%c0_52, %c0_53] : memref<20x320xf32, #tpu.memory_space<vmem>>, vector<16x320xf32>
    %67 = arith.truncf %66 : vector<16x320xf32> to vector<16x320xbf16>
    %c0_54 = arith.constant 0 : index
    %c0_55 = arith.constant 0 : index
    %c0_56 = arith.constant 0 : index
    %68 = vector.load %arg6[%c0_54, %c0_55, %c0_56] : memref<3x320x128xbf16, #tpu.memory_space<vmem>>, vector<1x320x128xbf16>
    %69 = vector.shape_cast %68 : vector<1x320x128xbf16> to vector<320x128xbf16>
    %cst_57 = arith.constant dense<0.000000e+00> : vector<16x128xf32>
    %70 = tpu.matmul %67, %69, %cst_57 {dimension_numbers = #tpu.dot_dimension_numbers<[1], [0], [0], [1], [0, 0, 1, 1], [], []>} : vector<16x320xbf16>, vector<320x128xbf16>, vector<16x128xf32> -> vector<16x128xf32>
    %71 = arith.addf %65, %70 : vector<16x128xf32>
    %c2_58 = arith.constant 2 : index
    %c0_59 = arith.constant 0 : index
    %72 = vector.load %arg11[%c2_58, %c0_59] : memref<20x320xf32, #tpu.memory_space<vmem>>, vector<16x320xf32>
    %73 = arith.truncf %72 : vector<16x320xf32> to vector<16x320xbf16>
    %c1_60 = arith.constant 1 : index
    %c0_61 = arith.constant 0 : index
    %c0_62 = arith.constant 0 : index
    %74 = vector.load %arg6[%c1_60, %c0_61, %c0_62] : memref<3x320x128xbf16, #tpu.memory_space<vmem>>, vector<1x320x128xbf16>
    %75 = vector.shape_cast %74 : vector<1x320x128xbf16> to vector<320x128xbf16>
    %cst_63 = arith.constant dense<0.000000e+00> : vector<16x128xf32>
    %76 = tpu.matmul %73, %75, %cst_63 {dimension_numbers = #tpu.dot_dimension_numbers<[1], [0], [0], [1], [0, 0, 1, 1], [], []>} : vector<16x320xbf16>, vector<320x128xbf16>, vector<16x128xf32> -> vector<16x128xf32>
    %77 = arith.addf %71, %76 : vector<16x128xf32>
    %c4_64 = arith.constant 4 : index
    %c0_65 = arith.constant 0 : index
    %78 = vector.load %arg11[%c4_64, %c0_65] : memref<20x320xf32, #tpu.memory_space<vmem>>, vector<16x320xf32>
    %79 = arith.truncf %78 : vector<16x320xf32> to vector<16x320xbf16>
    %c2_66 = arith.constant 2 : index
    %c0_67 = arith.constant 0 : index
    %c0_68 = arith.constant 0 : index
    %80 = vector.load %arg6[%c2_66, %c0_67, %c0_68] : memref<3x320x128xbf16, #tpu.memory_space<vmem>>, vector<1x320x128xbf16>
    %81 = vector.shape_cast %80 : vector<1x320x128xbf16> to vector<320x128xbf16>
    %cst_69 = arith.constant dense<0.000000e+00> : vector<16x128xf32>
    %82 = tpu.matmul %79, %81, %cst_69 {dimension_numbers = #tpu.dot_dimension_numbers<[1], [0], [0], [1], [0, 0, 1, 1], [], []>} : vector<16x320xbf16>, vector<320x128xbf16>, vector<16x128xf32> -> vector<16x128xf32>
    %83 = arith.addf %77, %82 : vector<16x128xf32>
    %c0_70 = arith.constant 0 : index
    %c0_71 = arith.constant 0 : index
    %84 = vector.load %arg7[%c0_70, %c0_71] : memref<1x128xf32, #tpu.memory_space<vmem>>, vector<1x128xf32>
    %85 = vector.broadcast %84 : vector<1x128xf32> to vector<16x128xf32>
    %86 = arith.addf %83, %85 : vector<16x128xf32>
    %87 = arith.addf %86, %1 : vector<16x128xf32>
    %c0_72 = arith.constant 0 : index
    %c0_73 = arith.constant 0 : index
    %c0_74 = arith.constant 0 : index
    %88 = vector.load %arg9[%c0_72, %c0_73, %c0_74] : memref<1x16x128xf32, #tpu.memory_space<vmem>>, vector<1x16x128xf32>
    %89 = vector.shape_cast %88 : vector<1x16x128xf32> to vector<16x128xf32>
    %90 = vector.shape_cast %87 : vector<16x128xf32> to vector<1x16x128xf32>
    tpu.vector_store %arg9[%c0_72, %c0_73, %c0_74], %90 {strides = array<i32>} : memref<1x16x128xf32, #tpu.memory_space<vmem>>, vector<1x16x128xf32>,
    return
  }
  func.func @transform_0(%arg0: i32) -> (i32, i32, i32) {
    %c0_i32 = arith.constant 0 : i32
    %c0_i32_0 = arith.constant 0 : i32
    %c0_i32_1 = arith.constant 0 : i32
    return %arg0, %c0_i32, %c0_i32_0 : i32, i32, i32
  }
  func.func @transform_1(%arg0: i32) -> (i32, i32, i32) {
    %c0_i32 = arith.constant 0 : i32
    %c0_i32_0 = arith.constant 0 : i32
    %c0_i32_1 = arith.constant 0 : i32
    %c0_i32_2 = arith.constant 0 : i32
    return %c0_i32, %c0_i32_0, %c0_i32_1 : i32, i32, i32
  }
  func.func @transform_2(%arg0: i32) -> (i32, i32) {
    %c0_i32 = arith.constant 0 : i32
    %c0_i32_0 = arith.constant 0 : i32
    %c0_i32_1 = arith.constant 0 : i32
    return %c0_i32, %c0_i32_0 : i32, i32
  }
  func.func @transform_3(%arg0: i32) -> (i32, i32, i32) {
    %c0_i32 = arith.constant 0 : i32
    %c0_i32_0 = arith.constant 0 : i32
    %c0_i32_1 = arith.constant 0 : i32
    %c0_i32_2 = arith.constant 0 : i32
    return %c0_i32, %c0_i32_0, %c0_i32_1 : i32, i32, i32
  }
  func.func @transform_4(%arg0: i32) -> (i32, i32) {
    %c0_i32 = arith.constant 0 : i32
    %c0_i32_0 = arith.constant 0 : i32
    %c0_i32_1 = arith.constant 0 : i32
    return %c0_i32, %c0_i32_0 : i32, i32
  }
  func.func @transform_5(%arg0: i32) -> (i32, i32, i32) {
    %c0_i32 = arith.constant 0 : i32
    %c0_i32_0 = arith.constant 0 : i32
    %c0_i32_1 = arith.constant 0 : i32
    %c0_i32_2 = arith.constant 0 : i32
    return %c0_i32, %c0_i32_0, %c0_i32_1 : i32, i32, i32
  }
  func.func @transform_6(%arg0: i32) -> (i32, i32) {
    %c0_i32 = arith.constant 0 : i32
    %c0_i32_0 = arith.constant 0 : i32
    %c0_i32_1 = arith.constant 0 : i32
    return %c0_i32, %c0_i32_0 : i32, i32
  }
  func.func @transform_7(%arg0: i32) -> i32 {
    %c0_i32 = arith.constant 0 : i32
    %c0_i32_0 = arith.constant 0 : i32
    return %c0_i32 : i32
  }
  func.func @transform_8(%arg0: i32) -> (i32, i32, i32) {
    %c0_i32 = arith.constant 0 : i32
    %c0_i32_0 = arith.constant 0 : i32
    %c0_i32_1 = arith.constant 0 : i32
    return %arg0, %c0_i32, %c0_i32_0 : i32, i32, i32
  }
}

</mosaic_0001>

<bundles_post_ra>
// kernel: sam_forward_pallas.1
= control target key start
LH: loop header
LB: loop body
LE: loop exit
PB: predicated region body
PF: predicated region fallthrough
CT: control target
= control target key end

     0   :  { %13 = vsyncpa [#allocation5], 0  ;;  %s3172_s27 = smov 0   ;;  %s3874_s0 = inlined_call_operand.vmem [shape: f32[2,16,128], index: 0, kind: input, shape index: {}]   ;;  %s3875_s1 = inlined_call_operand.vmem [shape: bf16[3,144,112], index: 1, kind: input, shape index: {}]   ;;  %s3876_s2 = inlined_call_operand.vmem [shape: f32[1,112], index: 2, kind: input, shape index: {}]   ;;  %s3877_s3 = inlined_call_operand.vmem [shape: bf16[3,176,144], index: 3, kind: input, shape index: {}]   ;;  %s3878_s4 = inlined_call_operand.vmem [shape: f32[1,144], index: 4, kind: input, shape index: {}]   ;;  %s3879_s5 = inlined_call_operand.vmem [shape: bf16[3,320,128], index: 5, kind: input, shape index: {}]   ;;  %s3880_s6 = inlined_call_operand.vmem [shape: f32[1,128], index: 6, kind: input, shape index: {}]   ;;  %s3881_s7 = inlined_call_operand.vmem [shape: f32[2], index: 7, kind: input, shape index: {}]   ;;  %s3882_s8 = inlined_call_operand.vmem [shape: f32[2,16,128], index: 8, kind: output, shape index: {}]  }
   0x1 LB: > { %s3178_s28 = sadd.s32 4294967295, %s3118_s27   ;;  %p2413_p0 = scmp.ge.s32.totalorder %s3118_s27, 1  ;;  %s3118_s27 = sphi %s3172_s27, %s19_s27  }
   0x2   : > { %p223_p1 = scmp.lt.s32.totalorder %s3118_s27, 3  ;;  %s254_s9 = sshll.u32 %s3881_s7, 4  ;;  %s255_s9 = int_to_ptr.vmem [resolvable:$true] %s254_s9 }
   0x3   : > { %p2887_p3 = scmp.eq.s32.totalorder %s3178_s28, 0  ;;  %s3093_s11 = scalar_lea.vmem %s255_s9, 16 }
   0x4   : > { %p3185_p2 = pnand %p2413_p0, %p223_p1  ;;  %p3094_p6 = scmp.ne.s32.totalorder %s255_s9, %s3093_s11 }
   0x5   : > { %p3101_p10 = scmp.lt.s32.totalorder %s255_s9, %s255_s9  ;;  %p3102_p11 = scmp.lt.s32.totalorder %s3093_s11, %s3093_s11 }
   0x6   : > { %p2883_p4 = pneg %p3185_p2 }
   0x7   : > { %p3103_p12 = por %p3102_p11, %p3101_p10 }
   0x8   : > { %p2884_p5 = pnand %p2887_p3, %p2883_p4 }
   0xa   : > { %p3095_p7 = pneg %p2884_p5 }
   0xc   : > { %p3096_p8 = pnand %p3095_p7, %p3094_p6 }
   0xe   : > { %p3097_p9 = pneg %p3096_p8 }
  0x10   : > { %p3104_p13 = pnand %p3103_p12, %p3097_p9 }
  0x12   : > { %3107 = shalt.err (!%p3104_p13)
}
  0x13   : > { %s3120_s12 = smov [#allocation4]   ;;  %275 = sbr.rel (%p3185_p2) target bundleno = 1101 (0x44d), region = 52 }
  0x14   : > { %2886 = dma.vmem_to_smem (!%p2884_p5), %s255_s9, 16, %s3120_s12, [#allocation5]  }
  0x1a   : > { %3113 = dma.done.wait (%p2887_p3), [#allocation5], 16  }
  0x1b   : > { %3115 = vsyncadd (%p2887_p3), [#allocation5], 4294967280 }
  0x1c   : > { %281 = sfence }
  0x1d   : > { %p310_p0 = scmp.lt.s32.totalorder %s3178_s28, 1  ;;  %vm324_vm0 = vcmask 392192   ;;  %v3121_v0 = vmov 0.0   ;;  %vm329_vm1 = vcmask 390144   ;;  %vm333_vm2 = vcmask 1042432   ;;  %s3122_s17 = smov 24  }
  0x1e   : > { %323 = vst [vmem:[#allocation2] sm:$0xff] %v3121_v0  ;;  %325 = vst.msk [vmem:[#allocation2 + $0x8] sm:$0xff] %vm324_vm0, %v3121_v0  ;;  %v2904_v6 = vld [vmem:[%s3875_s1] sm:$0xff]   ;;  %v2905_v7 = vld [vmem:[%s3875_s1 + $0x48] sm:$0xff]   ;;  %v3123_v8 = vmov 0   ;;  %vm346_vm3 = vcmask 1047747  }
  0x1f   : > { %326 = vst [vmem:[#allocation2 + $0x10] sm:$0xff] %v3121_v0  ;;  %327 = vst.msk [vmem:[#allocation2 + $0x18] sm:$0xff] %vm324_vm0, %v3121_v0  ;;  %s3885_s28 = smov (!%p310_p0, %s3178_s28), 1  ;;  %593 = vmatprep.subr.bf16.mxu1 %v3123_v8  ;;  %485 = vmatprep.subr.bf16.mxu0 %v3123_v8  ;;  %v2906_v9 = vld [vmem:[%s3875_s1 + $0x8] sm:$0xff]   ;;  %v2907_v10 = vld [vmem:[%s3875_s1 + $0x50] sm:$0xff]   ;;  %vm348_vm4 = vcmask 195587  }
  0x20   : > { %328 = vst [vmem:[#allocation2 + $0x20] sm:$0x3f] %v3121_v0  ;;  %1439 = vst [vmem:[#allocation3] sm:$0xff] %v3121_v0  ;;  %s2752_s13 = sshll.u32 %s3885_s28, 4  ;;  %594 = vmatpush1.bf16.msra.mxu1 %v2904_v6  ;;  %486 = vmatpush1.bf16.msra.mxu0 %v2905_v7  ;;  %v2908_v11 = vld [vmem:[%s3875_s1 + $0x10] sm:$0xff]   ;;  %v2909_v12 = vld [vmem:[%s3875_s1 + $0x58] sm:$0xff]  }
  0x21   : > { %1440 = vst [vmem:[#allocation3 + $0x8] sm:$0xff] %v3121_v0  ;;  %1443 = vst [vmem:[#allocation3 + $0x18] sm:$0xff] %v3121_v0  ;;  %s3214_s16 = scalar_lea.vmem %s3874_s0, %s2752_s13  ;;  %595 = vmatprep.subr.bf16.mxu1 %v3123_v8  ;;  %487 = vmatprep.subr.bf16.mxu0 %v3123_v8  ;;  %v2910_v13 = vld [vmem:[%s3875_s1 + $0x18] sm:$0xff]   ;;  %v2911_v14 = vld [vmem:[%s3875_s1 + $0x60] sm:$0xff]   ;;  %vm350_vm5 = vcmask 1047744   ;;  %vm352_vm6 = vcmask 195584   ;;  %s319_s23 = scalar_lea.vmem %s3882_s8, %s2752_s13 }
  0x22   : > { %1444 = vst [vmem:[#allocation3 + $0x20] sm:$0xff] %v3121_v0  ;;  %1446 = vst [vmem:[#allocation3 + $0x30] sm:$0xf] %v3121_v0  ;;  %v321_v1 = vld [vmem:[%s3214_s16] sm:$0xff]  ;;  %v322_v2 = vld [vmem:[%s3214_s16 + $0x8] sm:$0xff]  ;;  %vm354_vm7 = vcmask 1042624  }
  0x23   : > { %1447 = vst [vmem:[#allocation3 + $0x38] sm:$0xf] %v3121_v0  ;;  %330 = vst.msk [vmem:[#allocation2 + $0x28] sm:$0x3f] %vm329_vm1, %v3121_v0  ;;  %v334_v3 = vrot.slane %v321_v1, 5  ;;  %v335_v4 = vrot.slane %v322_v2, 5 }
  0x24   : > { %596 = vmatpush1.bf16.msra.mxu1 %v2906_v9  ;;  %488 = vmatpush1.bf16.msra.mxu0 %v2907_v10  ;;  %v2912_v15 = vld [vmem:[%s3875_s1 + $0x20] sm:$0xff]   ;;  %v2913_v16 = vld [vmem:[%s3875_s1 + $0x68] sm:$0xff]   ;;  %v2915_v18 = vld [vmem:[%s3875_s1 + $0x70] sm:$0xff]   ;;  %vm356_vm8 = vcmask 190464   ;;  %vm413_vm9 = vcmask 1045504   ;;  %vm850_vm10 = vcmask 1046528  }
  0x25   : > { %337 = vrot.lane.b32.xlu0 %v334_v3, %s3122_s17  ;;  %v336_v5 = vsel %vm333_vm2, %v334_v3, %v335_v4  ;;  %597 = vmatprep.subr.bf16.mxu1 %v3123_v8  ;;  %v2914_v17 = vld [vmem:[%s3875_s1 + $0x28] sm:$0xff]   ;;  %v2916_v19 = vld [vmem:[%s3875_s1 + $0x30] sm:$0xff]   ;;  %v2917_v20 = vld [vmem:[%s3875_s1 + $0x78] sm:$0xff]   ;;  %s3124_s22 = smov 112   ;;  %vm665_vm11 = vcmask 1044480   ;;  %vm481_vm12 = vcmask 130048  }
  0x26   : > { %489 = vmatprep.subr.bf16.mxu0 %v3123_v8  ;;  %v2918_v21 = vld [vmem:[%s3875_s1 + $0x38] sm:$0xff]   ;;  %v2919_v23 = vld [vmem:[%s3875_s1 + $0x80] sm:$0xff]   ;;  %v2924_v28 = vld [vmem:[%s3875_s1 + $0x88] sm:$0xff]   ;;  %vm424_vm13 = vcmask 916480   ;;  %s787_s18 = sld [smem:[#allocation4]]  ;;  %s2605_s9 = sld [smem:[#allocation4 + $0x1]] }
  0x27   : > { %v2920_v24 = vld [vmem:[%s3875_s1 + $0x40] sm:$0xff]   ;;  %v2923_v27 = vld [vmem:[%s3877_s3 + $0xb4] ss:$8 sps:$4 sm:$0xff]   ;;  %s3125_s26 = smov 40  }
  0x28   : > { %598 = vmatpush1.bf16.msra.mxu1 %v2908_v11  ;;  %490 = vmatpush1.bf16.msra.mxu0 %v2909_v12 }
  0x29   : > { %339 = vrot.lane.b32.xlu0 %v336_v5, %s3122_s17  ;;  %599 = vmatprep.subr.bf16.mxu1 %v3123_v8 }
  0x2a   : > { %491 = vmatprep.subr.bf16.mxu0 %v3123_v8 }
  0x2c   : > { %600 = vmatpush1.bf16.msra.mxu1 %v2910_v13  ;;  %492 = vmatpush1.bf16.msra.mxu0 %v2911_v14  ;;  %v2921_v13 = vld [vmem:[%s3877_s3 + $0xb0] ss:$8 sps:$4 sm:$0xff]  }
  0x2d   : > { %341 = vrot.lane.b32.xlu0 %v335_v4, %s3122_s17  ;;  %601 = vmatprep.subr.bf16.mxu1 %v3123_v8 }
  0x2e   : > { %493 = vmatprep.subr.bf16.mxu0 %v3123_v8 }
  0x30   : > { %602 = vmatpush1.bf16.msra.mxu1 %v2912_v15  ;;  %494 = vmatpush1.bf16.msra.mxu0 %v2913_v16  ;;  %v2927_v15 = vld [vmem:[%s3877_s3 + $0xc4] ss:$8 sps:$4 sm:$0xff]  }
  0x31   : > { %603 = vmatprep.subr.bf16.mxu1 %v3123_v8  ;;  %495 = vmatprep.subr.bf16.mxu0 %v3123_v8 }
  0x34   : > { %604 = vmatpush1.bf16.msra.mxu1 %v2914_v17  ;;  %496 = vmatpush1.bf16.msra.mxu0 %v2915_v18  ;;  %v2925_v18 = vld [vmem:[%s3877_s3 + $0xc0] ss:$8 sps:$4 sm:$0xff]  }
  0x35   : > { %605 = vmatprep.subr.bf16.mxu1 %v3123_v8  ;;  %497 = vmatprep.subr.bf16.mxu0 %v3123_v8 }
  0x38   : > { %606 = vmatpush1.bf16.msra.mxu1 %v2916_v19  ;;  %498 = vmatpush1.bf16.msra.mxu0 %v2917_v20  ;;  %v2928_v19 = vld [vmem:[%s3875_s1 + $0x90] sm:$0xff]  }
  0x39   : > { %607 = vmatprep.subr.bf16.mxu1 %v3123_v8  ;;  %499 = vmatprep.subr.bf16.mxu0 %v3123_v8 }
  0x3c   : > { %608 = vmatpush1.bf16.msra.mxu1 %v2918_v21  ;;  %500 = vmatpush1.bf16.msra.mxu0 %v2919_v23  ;;  %v2931_v23 = vld [vmem:[%s3877_s3 + $0xd4] ss:$8 sps:$4 sm:$0xff]  }
  0x3d   : > { %609 = vmatprep.subr.bf16.mxu1 %v3123_v8  ;;  %501 = vmatprep.subr.bf16.mxu0 %v3123_v8 }
  0x40   : > { %610 = vmatpush1.bf16.msra.mxu1 %v2920_v24  ;;  %502 = vmatpush1.bf16.msra.mxu0 %v2924_v28  ;;  %v2929_v24 = vld [vmem:[%s3877_s3 + $0xd0] ss:$8 sps:$4 sm:$0xff]   ;;  %v2936_v28 = vld [vmem:[%s3875_s1 + $0xa0] sm:$0xff]  }
  0x41   : > { %975 = vmatprep.subr.bf16.mxu1 %v2923_v27  ;;  %735 = vmatprep.subr.bf16.mxu0 %v3123_v8  ;;  %v2933_v27 = vld [vmem:[%s3877_s3 + $0xe0] ss:$8 sps:$4 sm:$0xff]  }
  0x97   : > { %v338_v22 = vpop.permute.xlu0 %337 }
  0x98   : > { %347 = vst.msk [vmem:[#allocation2] sm:$0xf8] %vm346_vm3, %v338_v22 }
  0x99   : > { %349 = vst.msk [vmem:[#allocation2 + $0x8] sm:$0xf8] %vm348_vm4, %v338_v22 }
  0x9b   : > { %v340_v25 = vpop.permute.xlu0 %339 }
  0x9c   : > { %351 = vst.msk [vmem:[#allocation2 + $0x10] sm:$0xff] %vm350_vm5, %v340_v25 }
  0x9d   : > { %353 = vst.msk [vmem:[#allocation2 + $0x18] sm:$0xff] %vm352_vm6, %v340_v25  ;;  %v2932_v25 = vld [vmem:[%s3875_s1 + $0x98] sm:$0xff]  }
  0x9f   : > { %v342_v26 = vpop.permute.xlu0 %341  ;;  %v358_v29 = vld [vmem:[#allocation2] sm:$0xfc] }
  0xa0   : > { %355 = vst.msk [vmem:[#allocation2 + $0x20] sm:$0x7] %vm354_vm7, %v342_v26  ;;  %v359_v33 = vld [vmem:[#allocation2 + $0x8] sm:$0xfc]  ;;  %v821_v40 = vld [vmem:[#allocation2] sm:$0xfc] }
  0xa1   : > { %357 = vst.msk [vmem:[#allocation2 + $0x28] sm:$0x7] %vm356_vm8, %v342_v26  ;;  %v383_v35 = vld [vmem:[#allocation2 + $0x8] sm:$0xf0]  ;;  %v382_v46 = vld [vmem:[#allocation2] sm:$0xf0] }
  0xa2   : > { %v822_v36 = vld [vmem:[#allocation2 + $0x8] sm:$0xfc]  ;;  %v634_v0 = vld [vmem:[#allocation2] sm:$0xc0]  ;;  %vm1480_vm7 = vcmask 1040384   ;;  %vm1448_vm8 = vcmask 519168  }
  0xa3   : > { %v3299_v30 = vld [vmem:[#allocation2 + $0x10] sm:$0xff]  ;;  %v635_v48 = vld [vmem:[#allocation2 + $0x8] sm:$0xc0] }
  0xa4   : > { %v3301_v31 = vld [vmem:[#allocation2 + $0x18] sm:$0xff]  ;;  %v362_v32 = vpack.c.bf16 %v3299_v30, %v358_v29  ;;  %v823_v44 = vpack.c.bf16 %v3299_v30, %v821_v40  ;;  %v386_v52 = vpack.c.bf16 %v3299_v30, %v382_v46  ;;  %v638_v3 = vpack.c.bf16 %v3299_v30, %v634_v0  ;;  %v2935_v26 = vld [vmem:[%s3877_s3 + $0xe4] ss:$8 sps:$4 sm:$0xff]   ;;  %v2970_v0 = vld [vmem:[%s3877_s3 + $0x20] ss:$8 sps:$4 sm:$0xff]  }
  0xa5   : > { %v363_v34 = vpack.c.bf16 %v3301_v31, %v359_v33  ;;  %v387_v38 = vpack.c.bf16 %v3301_v31, %v383_v35  ;;  %v824_v39 = vpack.c.bf16 %v3301_v31, %v822_v36  ;;  %v639_v53 = vpack.c.bf16 %v3301_v31, %v635_v48  ;;  %v2939_v29 = vld [vmem:[%s3877_s3 + $0xf4] ss:$8 sps:$4 sm:$0xff]   ;;  %v2940_v33 = vld [vmem:[%s3875_s1 + $0xa8] sm:$0xff]  }
  0xa6   : > { %v528_v37 = vrot.slane %v362_v32, 1  ;;  %v851_v60 = vrot.slane %v823_v44, 1  ;;  %v3334_v2 = vrot.slane %v386_v52, 2  ;;  %v666_v10 = vrot.slane %v638_v3, 3  ;;  %v2937_v32 = vld [vmem:[%s3877_s3 + $0xf0] ss:$8 sps:$4 sm:$0xff]  }
  0xa7   : > { %v384_v42 = vld [vmem:[#allocation2 + $0x20] sm:$0x3]  ;;  %v529_v51 = vrot.slane %v363_v34, 1  ;;  %v3320_v55 = vrot.slane %v387_v38, 2  ;;  %v854_v57 = vrot.slane %v824_v39, 1  ;;  %v669_v5 = vrot.slane %v639_v53, 3 }
  0xa8   : > { %v385_v41 = vld [vmem:[#allocation2 + $0x28] sm:$0x3]  ;;  %530 = vrot.lane.b32.xlu1 %v528_v37, %s3124_s22  ;;  %v3312_v47 = vpack.c.bf16 %v384_v42, %v384_v42  ;;  %v636_v50 = vld [vmem:[#allocation2 + $0x20] sm:$0xf]  ;;  %v2943_v34 = vld [vmem:[%s3877_s3 + $0x104] ss:$8 sps:$4 sm:$0xff]  }
  0xa9   : > { %v637_v43 = vld [vmem:[#allocation2 + $0x28] sm:$0xf]  ;;  %v3310_v45 = vpack.c.bf16 %v385_v41, %v385_v41  ;;  %v3318_v54 = vpack.c.bf16 %v636_v50, %v636_v50  ;;  %v2944_v36 = vld [vmem:[%s3875_s1 + $0xb0] sm:$0xff]   ;;  %v2948_v39 = vld [vmem:[%s3875_s1 + $0xb8] sm:$0xff]  }
  0xaa   : > { %v3314_v49 = vpack.c.bf16 %v637_v43, %v637_v43  ;;  %v415_v59 = vrot.slane %v3312_v47, 2  ;;  %v2941_v35 = vld [vmem:[%s3877_s3 + $0x100] ss:$8 sps:$4 sm:$0xff]   ;;  %v2947_v37 = vld [vmem:[%s3877_s3 + $0x114] ss:$8 sps:$4 sm:$0xff]  }
  0xab   : > { %v418_v56 = vrot.slane %v3310_v45, 2  ;;  %v852_v61 = vrot.slane %v3318_v54, 1  ;;  %v667_v7 = vrot.slane %v3318_v54, 3  ;;  %v2945_v38 = vld [vmem:[%s3877_s3 + $0x110] ss:$8 sps:$4 sm:$0xff]   ;;  %v2952_v42 = vld [vmem:[%s3875_s1 + $0xc0] sm:$0xff]  }
  0xac   : > { %v855_v58 = vrot.slane %v3314_v49, 1  ;;  %532 = vrot.lane.b32.xlu1 %v529_v51, %s3124_s22  ;;  %v670_v63 = vrot.slane %v3314_v49, 3  ;;  %v416_v6 = vsel %vm413_vm9, %v3334_v2, %v415_v59  ;;  %v2951_v40 = vld [vmem:[%s3877_s3 + $0x124] ss:$8 sps:$4 sm:$0xff]   ;;  %v2949_v41 = vld [vmem:[%s3877_s3 + $0x120] ss:$8 sps:$4 sm:$0xff]  }
  0xad   : > { %v419_v62 = vsel %vm413_vm9, %v3320_v55, %v418_v56  ;;  %v3340_v4 = vsel %vm850_vm10, %v851_v60, %v852_v61  ;;  %v668_v11 = vsel %vm665_vm11, %v666_v10, %v667_v7  ;;  %v2955_v43 = vld [vmem:[%s3877_s3 + $0x134] ss:$8 sps:$4 sm:$0xff]   ;;  %v2953_v44 = vld [vmem:[%s3877_s3 + $0x130] ss:$8 sps:$4 sm:$0xff]   ;;  %v2956_v46 = vld [vmem:[%s3875_s1 + $0xc8] sm:$0xff]  }
  0xae   : > { %v856_v1 = vsel %vm850_vm10, %v854_v57, %v855_v58  ;;  %422 = vrot.lane.b32.xlu0 %v419_v62, %s3124_s22  ;;  %v671_v9 = vsel %vm665_vm11, %v669_v5, %v670_v63  ;;  %v2959_v48 = vld [vmem:[%s3877_s3 + $0x144] ss:$8 sps:$4 sm:$0xff]   ;;  %v2957_v50 = vld [vmem:[%s3877_s3 + $0x140] ss:$8 sps:$4 sm:$0xff]   ;;  %v2960_v51 = vld [vmem:[%s3875_s1 + $0xd0] sm:$0xff]  }
  0xaf   : > { %v2963_v52 = vld [vmem:[%s3877_s3 + $0x154] ss:$8 sps:$4 sm:$0xff]   ;;  %v2961_v56 = vld [vmem:[%s3877_s3 + $0x150] ss:$8 sps:$4 sm:$0xff]   ;;  %v2966_v57 = vld [vmem:[%s3877_s3 + $0x4] ss:$8 sps:$4 sm:$0xff]  }
  0xb0   : > { %420 = vrot.lane.b32.xlu1 %v416_v6, %s3124_s22  ;;  %v2964_v59 = vld [vmem:[%s3877_s3] ss:$8 sps:$4 sm:$0xff]   ;;  %v2969_v60 = vld [vmem:[%s3877_s3 + $0x14] ss:$8 sps:$4 sm:$0xff]   ;;  %v2967_v62 = vld [vmem:[%s3877_s3 + $0x10] ss:$8 sps:$4 sm:$0xff]  }
  0xb1   : > { %v2972_v63 = vld [vmem:[%s3877_s3 + $0x24] ss:$8 sps:$4 sm:$0xff]   ;;  %v2975_v49 = vld [vmem:[%s3877_s3 + $0x34] ss:$8 sps:$4 sm:$0xff]   ;;  %v2973_v3 = vld [vmem:[%s3877_s3 + $0x30] ss:$8 sps:$4 sm:$0xff]  }
  0xb2   : > { %674 = vrot.lane.b32.xlu0 %v671_v9, %s3124_s22  ;;  %v2981_v54 = vld [vmem:[%s3877_s3 + $0x54] ss:$8 sps:$4 sm:$0xff]   ;;  %v2984_v5 = vld [vmem:[%s3877_s3 + $0x64] ss:$8 sps:$4 sm:$0xff]   ;;  %v2982_v6 = vld [vmem:[%s3877_s3 + $0x60] ss:$8 sps:$4 sm:$0xff]  }
  0xb3   : > { %v2987_v7 = vld [vmem:[%s3877_s3 + $0x74] ss:$8 sps:$4 sm:$0xff]   ;;  %v2985_v9 = vld [vmem:[%s3877_s3 + $0x70] ss:$8 sps:$4 sm:$0xff]   ;;  %v2990_v10 = vld [vmem:[%s3877_s3 + $0x84] ss:$8 sps:$4 sm:$0xff]  }
  0xb4   : > { %672 = vrot.lane.b32.xlu1 %v668_v11, %s3124_s22  ;;  %v2988_v11 = vld [vmem:[%s3877_s3 + $0x80] ss:$8 sps:$4 sm:$0xff]  }
 0x11a   : > { %v531_v12 = vpop.permute.xlu1 %530 }
 0x11e   : > { %v533_v14 = vpop.permute.xlu1 %532 }
 0x11f   : > { %2459 = vmatprep.mubr.msk.bf16.mxu1 %vm481_vm12, %v533_v14  ;;  %v534_v17 = vsel %vm424_vm13, %v531_v12, %v533_v14  ;;  %v2993_v12 = vld [vmem:[%s3877_s3 + $0x94] ss:$8 sps:$4 sm:$0xff]   ;;  %v2996_v14 = vld [vmem:[%s3877_s3 + $0xa4] ss:$8 sps:$4 sm:$0xff]  }
 0x120   : > { %v423_v16 = vpop.permute.xlu0 %422  ;;  %626 = vmatmul.mubr.bf16.vlgmr.msra.gmra.mrb[0].mxu1 %v534_v17  ;;  %v795_v17 = vld [vmem:[#allocation2] sm:$0xff] }
 0x121   : > { %2449 = vmatprep.mubr.msk.bf16.mxu0 %vm481_vm12, %v423_v16  ;;  %976 = vmatpush1.bf16.msra.mxu1 %v2921_v13  ;;  %v2991_v13 = vld [vmem:[%s3877_s3 + $0x90] ss:$8 sps:$4 sm:$0xff]  }
 0x122   : > { %2533 = vmatprep.mubr.msk.bf16.mxu1 %vm324_vm0, %v856_v1  ;;  %v421_v20 = vpop.permute.xlu1 %420  ;;  %977 = vmatprep.subr.bf16.mxu1 %v2927_v15  ;;  %v796_v1 = vld [vmem:[#allocation2 + $0x8] sm:$0xff] }
 0x123   : > { %v425_v22 = vsel %vm424_vm13, %v421_v20, %v423_v16  ;;  %v2994_v15 = vld [vmem:[%s3877_s3 + $0xa0] ss:$8 sps:$4 sm:$0xff]   ;;  %v2999_v16 = vld [vmem:[%s3877_s3 + $0x164] ss:$8 sps:$4 sm:$0xff]   ;;  %v797_v20 = vpack.c.bf16 %v3299_v30, %v795_v17 }
 0x124   : > { %v3364_v21 = vpop.permute.xlu0 %674  ;;  %518 = vmatmul.mubr.bf16.vlgmr.msra.gmra.mrb[0].mxu0 %v425_v22  ;;  %v3005_v30 = vld [vmem:[%s3877_s3 + $0x184] ss:$8 sps:$4 sm:$0xff]  }
 0x125   : > { %736 = vmatpush1.bf16.msra.mxu0 %v2928_v19  ;;  %978 = vmatpush1.bf16.msra.mxu1 %v2925_v18  ;;  %v2997_v18 = vld [vmem:[%s3877_s3 + $0x160] ss:$8 sps:$4 sm:$0xff]  }
 0x126   : > { %2487 = vmatprep.mubr.msk.bf16.mxu0 %vm481_vm12, %v3364_v21  ;;  %737 = vmatprep.subr.bf16.mxu0 %v3123_v8  ;;  %v673_v53 = vpop.permute.xlu1 %672  ;;  %v1194_v19 = vld [vmem:[#allocation2 + $0x28] sm:$0x3f] }
 0x127   : > { %979 = vmatprep.subr.bf16.mxu1 %v2931_v23  ;;  %v1196_v22 = vpack.c.bf16 %v1194_v19, %v1194_v19  ;;  %v3000_v23 = vld [vmem:[%s3877_s3 + $0x170] ss:$8 sps:$4 sm:$0xff]  }
 0x129   : > { %738 = vmatpush1.bf16.msra.mxu0 %v2932_v25  ;;  %980 = vmatpush1.bf16.msra.mxu1 %v2929_v24  ;;  %v1224_v24 = vrot.slane %v1196_v22, 2  ;;  %v3003_v25 = vld [vmem:[%s3877_s3 + $0x180] ss:$8 sps:$4 sm:$0xff]  }
 0x12a   : > { %739 = vmatprep.subr.bf16.mxu0 %v3123_v8  ;;  %981 = vmatprep.subr.bf16.mxu1 %v2935_v26 }
 0x12b   : > { %v1225_v26 = vsel %vm413_vm9, %v3320_v55, %v1224_v24  ;;  %v3014_v55 = vld [vmem:[%s3877_s3 + $0x1b4] ss:$8 sps:$4 sm:$0xff]  }
 0x12d   : > { %740 = vmatpush1.bf16.msra.mxu0 %v2936_v28  ;;  %982 = vmatpush1.bf16.msra.mxu1 %v2933_v27  ;;  %v3006_v27 = vld [vmem:[%s3877_s3 + $0x190] ss:$8 sps:$4 sm:$0xff]   ;;  %v3011_v28 = vld [vmem:[%s3877_s3 + $0x1a4] ss:$8 sps:$4 sm:$0xff]  }
 0x12e   : > { %741 = vmatprep.subr.bf16.mxu0 %v3123_v8  ;;  %983 = vmatprep.subr.bf16.mxu1 %v2939_v29  ;;  %v3012_v29 = vld [vmem:[%s3877_s3 + $0x1b0] ss:$8 sps:$4 sm:$0xff]  }
 0x131   : > { %742 = vmatpush1.bf16.msra.mxu0 %v2940_v33  ;;  %984 = vmatpush1.bf16.msra.mxu1 %v2937_v32  ;;  %v3017_v32 = vld [vmem:[%s3877_s3 + $0x1c4] ss:$8 sps:$4 sm:$0xff]   ;;  %v3015_v33 = vld [vmem:[%s3877_s3 + $0x1c0] ss:$8 sps:$4 sm:$0xff]  }
 0x132   : > { %743 = vmatprep.subr.bf16.mxu0 %v3123_v8  ;;  %985 = vmatprep.subr.bf16.mxu1 %v2943_v34  ;;  %v3020_v34 = vld [vmem:[%s3877_s3 + $0x1d4] ss:$8 sps:$4 sm:$0xff]  }
 0x135   : > { %744 = vmatpush1.bf16.msra.mxu0 %v2944_v36  ;;  %986 = vmatpush1.bf16.msra.mxu1 %v2941_v35  ;;  %v3018_v35 = vld [vmem:[%s3877_s3 + $0x1d0] ss:$8 sps:$4 sm:$0xff]   ;;  %v3023_v36 = vld [vmem:[%s3877_s3 + $0x1e4] ss:$8 sps:$4 sm:$0xff]  }
 0x136   : > { %745 = vmatprep.subr.bf16.mxu0 %v3123_v8  ;;  %987 = vmatprep.subr.bf16.mxu1 %v2947_v37  ;;  %v3021_v37 = vld [vmem:[%s3877_s3 + $0x1e0] ss:$8 sps:$4 sm:$0xff]  }
 0x139   : > { %746 = vmatpush1.bf16.msra.mxu0 %v2948_v39  ;;  %988 = vmatpush1.bf16.msra.mxu1 %v2945_v38  ;;  %v3026_v38 = vld [vmem:[%s3877_s3 + $0x1f4] ss:$8 sps:$4 sm:$0xff]   ;;  %v1193_v39 = vld [vmem:[#allocation2 + $0x20] sm:$0x3f] }
 0x13a   : > { %747 = vmatprep.subr.bf16.mxu0 %v3123_v8  ;;  %989 = vmatprep.subr.bf16.mxu1 %v2951_v40  ;;  %v3024_v40 = vld [vmem:[%s3877_s3 + $0x1f0] ss:$8 sps:$4 sm:$0xff]  }
 0x13d   : > { %748 = vmatpush1.bf16.msra.mxu0 %v2952_v42  ;;  %990 = vmatpush1.bf16.msra.mxu1 %v2949_v41  ;;  %v3029_v41 = vld [vmem:[%s3877_s3 + $0x204] ss:$8 sps:$4 sm:$0xff]   ;;  %v1195_v42 = vpack.c.bf16 %v1193_v39, %v1193_v39 }
 0x13e   : > { %749 = vmatprep.subr.bf16.mxu0 %v3123_v8  ;;  %991 = vmatprep.subr.bf16.mxu1 %v2955_v43  ;;  %v3027_v43 = vld [vmem:[%s3877_s3 + $0x200] ss:$8 sps:$4 sm:$0xff]  }
 0x141   : > { %750 = vmatpush1.bf16.msra.mxu0 %v2956_v46  ;;  %992 = vmatpush1.bf16.msra.mxu1 %v2953_v44  ;;  %v1222_v44 = vrot.slane %v1195_v42, 2  ;;  %v3604_v46 = vld [vmem:[#allocation3] sm:$0xff] }
 0x142   : > { %751 = vmatprep.subr.bf16.mxu0 %v3123_v8  ;;  %993 = vmatprep.subr.bf16.mxu1 %v2959_v48  ;;  %v676_v8 = vsel %vm424_vm13, %v673_v53, %v3364_v21  ;;  %v3002_v21 = vld [vmem:[%s3877_s3 + $0x174] ss:$8 sps:$4 sm:$0xff]   ;;  %1449 = vst.msk [vmem:[#allocation3 + $0x40] sm:$0xf] %vm1448_vm8, %v3604_v46  ;;  %vm3126_vm13 = vmmov 0   ;;  %vm1515_vm8 = vcmask 457729  }
 0x143   : > { %v1223_v48 = vsel %vm413_vm9, %v3334_v2, %v1222_v44  ;;  %v2488_v2 = vld [vmem:[%s3876_s2] ss:$0 sm:$0xff] }
 0x145   : > { %752 = vmatpush1.bf16.msra.mxu0 %v2960_v51  ;;  %994 = vmatpush1.bf16.msra.mxu1 %v2957_v50 }
 0x146   : > { %995 = vmatprep.subr.bf16.mxu1 %v2963_v52 }
 0x148   : > { %768 = vmatmul.mubr.bf16.vlgmr.msra.gmra.mrb[4].mxu0 %v676_v8 }
 0x149   : > { %996 = vmatpush1.bf16.msra.mxu1 %v2961_v56 }
 0x14a   : > { %1142 = vmatprep.subr.bf16.mxu1 %v2966_v57 }
 0x14c   : > { %1008 = vmatmul.mubr.bf16.vlgmr.msra.gmra.mrb[4].mxu1 %v3340_v4  ;;  %v2978_v4 = vld [vmem:[%s3877_s3 + $0x44] ss:$8 sps:$4 sm:$0xff]  }
 0x14d   : > { %2534 = vmatprep.mubr.msk.bf16.mxu1 %vm324_vm0, %v855_v58  ;;  %1143 = vmatpush1.bf16.msra.mxu1 %v2964_v59  ;;  %v798_v58 = vpack.c.bf16 %v3301_v31, %v796_v1  ;;  %v2976_v31 = vld [vmem:[%s3877_s3 + $0x40] ss:$8 sps:$4 sm:$0xff]  }
 0x14e   : > { %1144 = vmatprep.subr.bf16.mxu1 %v2969_v60 }
 0x151   : > { %1145 = vmatpush1.bf16.msra.mxu1 %v2967_v62 }
 0x152   : > { %1146 = vmatprep.subr.bf16.mxu1 %v2972_v63 }
 0x154   : > { %1018 = vmatmul.mubr.bf16.gmra.mrb[8].mxu1 %v852_v61  ;;  %v2979_v61 = vld [vmem:[%s3877_s3 + $0x50] ss:$8 sps:$4 sm:$0xff]  }
 0x155   : > { %1147 = vmatpush1.bf16.msra.mxu1 %v2970_v0  ;;  %2557 = vmatprep.mubr.msk.bf16.mxu1 %vm324_vm0, %v798_v58  ;;  %v3031_v58 = vld [vmem:[%s3879_s5 + $0xa0] sm:$0xff]  }
 0x156   : > { %1148 = vmatprep.subr.bf16.mxu1 %v2975_v49  ;;  %v3030_v49 = vld [vmem:[%s3879_s5 + $0xe0] sm:$0xff]  }
 0x157   : > { %2754 = vmatprep.subr.bf16.mxu0 %v3030_v49 }
 0x158   : > { %2755 = vmatpush3.bf16.msra.mxu0 %v3031_v58 }
 0x159   : > { %1149 = vmatpush1.bf16.msra.mxu1 %v2973_v3  ;;  %v3032_v3 = vld [vmem:[%s3879_s5 + $0xe8] sm:$0xff]  }
 0x15a   : > { %1150 = vmatprep.subr.bf16.mxu1 %v2978_v4  ;;  %v790_v4 = vstv %s787_s18  ;;  %2756 = vmatprep.subr.bf16.mxu0 %v3032_v3 }
 0x15d   : > { %1151 = vmatpush1.bf16.msra.mxu1 %v2976_v31 }
 0x15e   : > { %1152 = vmatprep.subr.bf16.mxu1 %v2981_v54 }
 0x161   : > { %1153 = vmatpush1.bf16.msra.mxu1 %v2979_v61 }
 0x162   : > { %1154 = vmatprep.subr.bf16.mxu1 %v2984_v5 }
 0x165   : > { %1155 = vmatpush1.bf16.msra.mxu1 %v2982_v6  ;;  %v3033_v6 = vld [vmem:[%s3879_s5 + $0xa8] sm:$0xff]  }
 0x166   : > { %1156 = vmatprep.subr.bf16.mxu1 %v2987_v7  ;;  %2757 = vmatpush3.bf16.msra.mxu0 %v3033_v6 }
 0x169   : > { %1157 = vmatpush1.bf16.msra.mxu1 %v2985_v9 }
 0x16a   : > { %1158 = vmatprep.subr.bf16.mxu1 %v2990_v10 }
 0x16d   : > { %1159 = vmatpush1.bf16.msra.mxu1 %v2988_v11 }
 0x16e   : > { %1160 = vmatprep.subr.bf16.mxu1 %v2993_v12 }
 0x171   : > { %1161 = vmatpush1.bf16.msra.mxu1 %v2991_v13 }
 0x172   : > { %1162 = vmatprep.subr.bf16.mxu1 %v2996_v14 }
 0x175   : > { %1163 = vmatpush1.bf16.msra.mxu1 %v2994_v15 }
 0x176   : > { %1344 = vmatprep.subr.bf16.mxu1 %v2999_v16 }
 0x178   : > { %1175 = vmatmul.mubr.bf16.vlgmr.msra.gmra.mrb[4].mxu1 %v797_v20 }
 0x179   : > { %2558 = vmatprep.mubr.msk.bf16.mxu1 %vm324_vm0, %v3310_v45  ;;  %1345 = vmatpush1.bf16.msra.mxu1 %v2997_v18  ;;  %v3008_v45 = vld [vmem:[%s3877_s3 + $0x194] ss:$8 sps:$4 sm:$0xff]  }
 0x17a   : > { %1346 = vmatprep.subr.bf16.mxu1 %v3002_v21 }
 0x17d   : > { %1347 = vmatpush1.bf16.msra.mxu1 %v3000_v23 }
 0x17e   : > { %1348 = vmatprep.subr.bf16.mxu1 %v3005_v30 }
 0x180   : > { %1185 = vmatmul.mubr.bf16.gmra.mrb[12].mxu1 %v3312_v47  ;;  %v3009_v47 = vld [vmem:[%s3877_s3 + $0x1a0] ss:$8 sps:$4 sm:$0xff]  }
 0x181   : > { %1349 = vmatpush1.bf16.msra.mxu1 %v3003_v25  ;;  %2603 = vmatprep.mubr.msk.bf16.mxu1 %vm324_vm0, %v1225_v26  ;;  %v1403_v25 = vlaneseq }
 0x182   : > { %1350 = vmatprep.subr.bf16.mxu1 %v3008_v45 }
 0x183   : > { %v1404_v45 = vshrl.u32 %v1403_v25, 7 }
 0x185   : > { %1351 = vmatpush1.bf16.msra.mxu1 %v3006_v27  ;;  %v1405_v26 = vsub.s32 0, %v1404_v45  ;;  %v1401_v27 = vld [vmem:[%s3878_s4] sm:$0x3] }
 0x186   : > { %1352 = vmatprep.subr.bf16.mxu1 %v3011_v28  ;;  %v1409_v28 = vsub.s32 1, %v1404_v45 }
 0x189   : > { %1353 = vmatpush1.bf16.msra.mxu1 %v3009_v47  ;;  %v3034_v47 = vld [vmem:[%s3879_s5 + $0xf0] sm:$0xff]  }
 0x18a   : > { %1354 = vmatprep.subr.bf16.mxu1 %v3014_v55  ;;  %v3035_v55 = vld [vmem:[%s3879_s5 + $0xb0] sm:$0xff]   ;;  %2758 = vmatprep.subr.bf16.mxu0 %v3034_v47 }
 0x18b   : > { %2759 = vmatpush3.bf16.msra.mxu0 %v3035_v55 }
 0x18d   : > { %1355 = vmatpush1.bf16.msra.mxu1 %v3012_v29  ;;  %v1406_v29 = vrot.slane %v1401_v27, %v1405_v26 }
 0x18e   : > { %1356 = vmatprep.subr.bf16.mxu1 %v3017_v32  ;;  %v1410_v32 = vrot.slane %v1401_v27, %v1409_v28 }
 0x191   : > { %1357 = vmatpush1.bf16.msra.mxu1 %v3015_v33  ;;  %v3036_v33 = vld [vmem:[%s3879_s5 + $0xf8] sm:$0xff]  }
 0x192   : > { %1358 = vmatprep.subr.bf16.mxu1 %v3020_v34  ;;  %v3037_v34 = vld [vmem:[%s3879_s5 + $0xb8] sm:$0xff]   ;;  %2760 = vmatprep.subr.bf16.mxu0 %v3036_v33 }
 0x193   : > { %2761 = vmatpush3.bf16.msra.mxu0 %v3037_v34 }
 0x195   : > { %1359 = vmatpush1.bf16.msra.mxu1 %v3018_v35 }
 0x196   : > { %1360 = vmatprep.subr.bf16.mxu1 %v3023_v36  ;;  %v1426_v36 = vstv %s2605_s9 }
 0x199   : > { %1361 = vmatpush1.bf16.msra.mxu1 %v3021_v37 }
 0x19a   : > { %1362 = vmatprep.subr.bf16.mxu1 %v3026_v38 }
 0x19d   : > { %1363 = vmatpush1.bf16.msra.mxu1 %v3024_v40 }
 0x19e   : > { %1364 = vmatprep.subr.bf16.mxu1 %v3029_v41 }
 0x1a1   : > { %1365 = vmatpush1.bf16.msra.mxu1 %v3027_v43 }
 0x1a2   : > { %2859 = vmatprep.subr.bf16.mxu1 %v3604_v46 }
 0x1a4   : > { %1377 = vmatmul.mubr.bf16.vlgmr.msra.gmra.mrb[4].mxu1 %v1223_v48  ;;  %v3039_v48 = vld [vmem:[%s3879_s5 + $0xc0] sm:$0xff]  }
 0x1a5   : > { %2604 = vmatprep.mubr.msk.bf16.mxu1 %vm324_vm0, %v1224_v24  ;;  %vm1441_vm0 = vcmask 523264  }
 0x1a6   : > { %1442 = vst.msk [vmem:[#allocation3 + $0x10] sm:$0xff] %vm1441_vm0, %v3604_v46  ;;  %1445 = vst.msk [vmem:[#allocation3 + $0x28] sm:$0xff] %vm1441_vm0, %v3604_v46 }
 0x1ac   : > { %1387 = vmatmul.mubr.bf16.gmra.mrb[16].mxu1 %v1222_v44  ;;  %v3038_v44 = vld [vmem:[%s3879_s5 + $0x100] sm:$0xff]  }
 0x1ad   : > { %2762 = vmatprep.subr.bf16.mxu0 %v3038_v44  ;;  %2867 = vmatprep.mubr.msk.bf16.mxu1 %vm3126_vm13, %v3604_v46 }
 0x1ae   : > { %2763 = vmatpush3.bf16.msra.mxu0 %v3039_v48 }
 0x1f3   : > { %v627_v50 = vpop.f32.mrb[0].mxu1 }
 0x1f4   : > { %v629_v51 = vpop.f32.mrb[1].mxu1 }
 0x1f5   : > { %v630_v52 = vpop.f32.mrb[2].mxu1 }
 0x1f6   : > { %v632_v53 = vpop.f32.mrb[3].mxu1 }
 0x1f7   : > { %v519_v56 = vpop.f32.mrb[0].mxu0 }
 0x1f8   : > { %v628_v57 = vadd.f32 %v627_v50, %v519_v56  ;;  %v521_v8 = vpop.f32.mrb[1].mxu0 }
 0x1f9   : > { %v522_v59 = vpop.f32.mrb[2].mxu0 }
 0x1fa   : > { %v631_v60 = vadd.f32 %v630_v52, %v522_v59  ;;  %v524_v62 = vpop.f32.mrb[3].mxu0 }
 0x21b   : > { %v769_v63 = vpop.f32.mrb[4].mxu0 }
 0x21c   : > { %v776_v0 = vadd.f32 %v769_v63, %v628_v57  ;;  %v771_v1 = vpop.f32.mrb[5].mxu0 }
 0x21d   : > { %v772_v31 = vpop.f32.mrb[6].mxu0  ;;  %v3042_v1 = vld [vmem:[%s3879_s5 + $0x1c0] sm:$0xff]  }
 0x21e   : > { %v785_v54 = vadd.f32 %v2488_v2, %v776_v0  ;;  %v777_v61 = vadd.f32 %v772_v31, %v631_v60  ;;  %v774_v5 = vpop.f32.mrb[7].mxu0  ;;  %v3041_v0 = vld [vmem:[%s3879_s5 + $0xc8] sm:$0xff]   ;;  %2860 = vmatpush3.bf16.msra.mxu1 %v3042_v1 }
 0x21f   : > { %2861 = vmatprep.subr.bf16.mxu1 %v3604_v46 }
 0x220   : > { %v791_v7 = vmul.f32 %v790_v4, %v785_v54  ;;  %v786_v9 = vadd.f32 %v2488_v2, %v777_v61  ;;  %vm788_vm14 = vcmp.ge.f32.partialorder %v785_v54, 0.0  ;;  %v3040_v2 = vld [vmem:[%s3879_s5 + $0x108] sm:$0xff]  }
 0x221   : > { %2764 = vmatprep.subr.bf16.mxu0 %v3040_v2  ;;  %v3051_v2 = vld [vmem:[%s3879_s5 + $0x128] sm:$0xff]  }
 0x222   : > { %vm789_vm15 = vcmp.ge.f32.partialorder %v786_v9, 0.0  ;;  %v792_v10 = vmul.f32 %v790_v4, %v786_v9  ;;  %v793_v11 = vsel %vm788_vm14, %v785_v54, %v791_v7  ;;  %2765 = vmatpush3.bf16.msra.mxu0 %v3041_v0  ;;  %vm1465_vm14 = vcmask 64515  }
 0x223   : > { %v1452_v12 = vrot.slane %v793_v11, 5  ;;  %v3045_v11 = vld [vmem:[%s3879_s5 + $0x1c8] sm:$0xff]  }
 0x224   : > { %v794_v13 = vsel %vm789_vm15, %v786_v9, %v792_v10  ;;  %v3043_v9 = vld [vmem:[%s3879_s5 + $0x110] sm:$0xff]   ;;  %2862 = vmatpush3.bf16.msra.mxu1 %v3045_v11  ;;  %vm1468_vm15 = vcmask 64512   ;;  %v3056_v11 = vld [vmem:[%s3879_s5 + $0x48] sm:$0xff]  }
 0x225   : > { %1455 = vrot.lane.b32.xlu1 %v1452_v12, %s3122_s17  ;;  %v1453_v14 = vrot.slane %v794_v13, 5  ;;  %v3044_v10 = vld [vmem:[%s3879_s5 + $0xd0] sm:$0xff]   ;;  %v3046_v13 = vld [vmem:[%s3879_s5 + $0x118] sm:$0xff]   ;;  %2766 = vmatprep.subr.bf16.mxu0 %v3043_v9  ;;  %v3055_v9 = vld [vmem:[%s3879_s5] sm:$0xff]  }
 0x226   : > { %2767 = vmatpush3.bf16.msra.mxu0 %v3044_v10  ;;  %2863 = vmatprep.subr.bf16.mxu1 %v3604_v46 }
 0x227   : > { %v1019_v15 = vpop.f32.mrb[8].mxu1  ;;  %v1454_v16 = vsel %vm333_vm2, %v1452_v12, %v1453_v14  ;;  %2768 = vmatprep.subr.bf16.mxu0 %v3046_v13 }
 0x228   : > { %v1021_v17 = vpop.f32.mrb[9].mxu1  ;;  %1457 = vrot.lane.b32.xlu0 %v1454_v16, %s3122_s17  ;;  %v3048_v16 = vld [vmem:[%s3879_s5 + $0x1d0] sm:$0xff]  }
 0x229   : > { %v1023_v18 = vpop.f32.mrb[10].mxu1  ;;  %1459 = vrot.lane.b32.xlu1 %v1453_v14, %s3122_s17  ;;  %2864 = vmatpush3.bf16.msra.mxu1 %v3048_v16  ;;  %v3059_v16 = vld [vmem:[%s3879_s5 + $0x10] sm:$0xff]  }
 0x22a   : > { %v1024_v19 = vpop.f32.mrb[11].mxu1  ;;  %v3047_v18 = vld [vmem:[%s3879_s5 + $0xd8] sm:$0xff]   ;;  %2865 = vmatprep.subr.bf16.mxu1 %v3604_v46 }
 0x22b   : > { %2769 = vmatpush3.bf16.msra.mxu0 %v3047_v18  ;;  %v3061_v18 = vld [vmem:[%s3879_s5 + $0x18] sm:$0xff]  }
 0x22c   : > { %2835 = vmatprep.subr.bf16.mxu0 %v3604_v46 }
 0x253   : > { %v1186_v20 = vpop.f32.mrb[12].mxu1 }
 0x254   : > { %v1187_v21 = vadd.f32 %v1186_v20, %v1019_v15  ;;  %v1188_v22 = vpop.f32.mrb[13].mxu1 }
 0x255   : > { %v1189_v23 = vadd.f32 %v1188_v22, %v1021_v17  ;;  %v1190_v30 = vpop.f32.mrb[14].mxu1 }
 0x256   : > { %v1191_v24 = vpop.f32.mrb[15].mxu1  ;;  %v3050_v30 = vld [vmem:[%s3879_s5 + $0x1d8] sm:$0xff]  }
 0x257   : > { %2866 = vmatpush3.bf16.msra.mxu1 %v3050_v30  ;;  %v3067_v30 = vld [vmem:[%s3879_s5 + $0x30] sm:$0xff]  }
 0x277   : > { %v1378_v35 = vpop.f32.mrb[4].mxu1 }
 0x278   : > { %v1413_v37 = vadd.f32 %v1406_v29, %v1378_v35  ;;  %v1380_v38 = vpop.f32.mrb[5].mxu1 }
 0x279   : > { %v1414_v39 = vadd.f32 %v1410_v32, %v1380_v38  ;;  %v1382_v40 = vpop.f32.mrb[6].mxu1 }
 0x27a   : > { %vm1420_vm1 = vcmp.ge.f32.partialorder %v1413_v37, 0.0  ;;  %v1427_v41 = vmul.f32 %v1426_v36, %v1413_v37  ;;  %v1415_v42 = vadd.f32 %v1406_v29, %v1382_v40  ;;  %v1384_v43 = vpop.f32.mrb[7].mxu1 }
 0x27b   : > { %vm1421_vm2 = vcmp.ge.f32.partialorder %v1414_v39, 0.0  ;;  %v1428_v50 = vmul.f32 %v1426_v36, %v1414_v39  ;;  %v1416_v51 = vadd.f32 %v1410_v32, %v1384_v43 }
 0x27c   : > { %vm1422_vm4 = vcmp.ge.f32.partialorder %v1415_v42, 0.0  ;;  %v1429_v52 = vmul.f32 %v1426_v36, %v1415_v42  ;;  %v1433_v53 = vsel %vm1420_vm1, %v1413_v37, %v1427_v41  ;;  %vm1470_vm1 = vcmask 1040576  }
 0x27d   : > { %vm1423_vm6 = vcmp.ge.f32.partialorder %v1416_v51, 0.0  ;;  %v1430_v56 = vmul.f32 %v1426_v36, %v1416_v51  ;;  %v1481_v57 = vrot.slane %v1433_v53, 7  ;;  %v1434_v8 = vsel %vm1421_vm2, %v1414_v39, %v1428_v50 }
 0x27e   : > { %v1435_v59 = vsel %vm1422_vm4, %v1415_v42, %v1429_v52  ;;  %v1482_v4 = vrot.slane %v1434_v8, 7  ;;  %vm1472_vm2 = vcmask 57344   ;;  %vm1513_vm4 = vcmask 1047873  }
 0x27f   : > { %v1483_v60 = vrot.slane %v1435_v59, 7  ;;  %v1436_v62 = vsel %vm1423_vm6, %v1416_v51, %v1430_v56  ;;  %v1388_v63 = vpop.f32.mrb[16].mxu1  ;;  %1491 = vrot.lane.b32.xlu0 %v1481_v57, %s3125_s26  ;;  %vm1517_vm6 = vcmask 1047872   ;;  %v3049_v56 = vld [vmem:[%s3879_s5 + $0x120] sm:$0xff]  }
 0x280   : > { %v1485_v49 = vrot.slane %v1436_v62, 7  ;;  %v1399_v58 = vadd.f32 %v1388_v63, %v1187_v21  ;;  %v1390_v3 = vpop.f32.mrb[17].mxu1 }
 0x281   : > { %v1400_v31 = vadd.f32 %v1390_v3, %v1189_v23  ;;  %v1392_v54 = vpop.f32.mrb[18].mxu1  ;;  %v1484_v61 = vsel %vm1480_vm7, %v1481_v57, %v1483_v60 }
 0x282   : > { %v1417_v5 = vadd.f32 %v1406_v29, %v1399_v58  ;;  %v1393_v6 = vpop.f32.mrb[19].mxu1  ;;  %1495 = vrot.lane.b32.xlu1 %v1484_v61, %s3125_s26  ;;  %v1486_v7 = vsel %vm1480_vm7, %v1482_v4, %v1485_v49  ;;  %v3052_v58 = vld [vmem:[%s3879_s5 + $0x130] sm:$0xff]   ;;  %v3053_v54 = vld [vmem:[%s3879_s5 + $0x138] sm:$0xff]  }
 0x283   : > { %v1418_v12 = vadd.f32 %v1410_v32, %v1400_v31 }
 0x284   : > { %vm1424_vm11 = vcmp.ge.f32.partialorder %v1417_v5, 0.0  ;;  %v1431_v14 = vmul.f32 %v1426_v36, %v1417_v5 }
 0x285   : > { %vm1425_vm12 = vcmp.ge.f32.partialorder %v1418_v12, 0.0  ;;  %v1432_v15 = vmul.f32 %v1426_v36, %v1418_v12 }
 0x286   : > { %1493 = vrot.lane.b32.xlu1 %v1482_v4, %s3125_s26  ;;  %v1437_v17 = vsel %vm1424_vm11, %v1417_v5, %v1431_v14  ;;  %vm1523_vm11 = vcmask 452608   ;;  %v3054_v5 = vld [vmem:[%s3879_s5 + $0x40] sm:$0xff]   ;;  %v3057_v14 = vld [vmem:[%s3879_s5 + $0x8] sm:$0xff]  }
 0x287   : > { %v1487_v19 = vrot.slane %v1437_v17, 7  ;;  %v1438_v20 = vsel %vm1425_vm12, %v1418_v12, %v1432_v15  ;;  %v3058_v15 = vld [vmem:[%s3879_s5 + $0x50] sm:$0xff]   ;;  %v3060_v17 = vld [vmem:[%s3879_s5 + $0x58] sm:$0xff]  }
 0x288   : > { %v1489_v21 = vrot.slane %v1438_v20, 7  ;;  %v3063_v20 = vld [vmem:[%s3879_s5 + $0x20] sm:$0xff]  }
 0x289   : > { %v1488_v22 = vsel %vm1480_vm7, %v1483_v60, %v1487_v19  ;;  %v3062_v19 = vld [vmem:[%s3879_s5 + $0x60] sm:$0xff]  }
 0x28a   : > { %1499 = vrot.lane.b32.xlu0 %v1488_v22, %s3125_s26  ;;  %v1490_v23 = vsel %vm1480_vm7, %v1485_v49, %v1489_v21  ;;  %vm1503_vm7 = vcmask 326656   ;;  %v3064_v21 = vld [vmem:[%s3879_s5 + $0x68] sm:$0xff]  }
 0x28b   : > { %1501 = vrot.lane.b32.xlu1 %v1490_v23, %s3125_s26  ;;  %v3065_v22 = vld [vmem:[%s3879_s5 + $0x28] sm:$0xff]   ;;  %v3066_v23 = vld [vmem:[%s3879_s5 + $0x70] sm:$0xff]  }
 0x28e   : > { %1497 = vrot.lane.b32.xlu0 %v1486_v7, %s3125_s26 }
 0x297   : > { %v1456_v24 = vpop.permute.xlu1 %1455 }
 0x298   : > { %1464 = vst.msk [vmem:[#allocation3] sm:$0xf8] %vm346_vm3, %v1456_v24  ;;  %vm1521_vm3 = vcmask 1042752  }
 0x299   : > { %1466 = vst.msk [vmem:[#allocation3 + $0x8] sm:$0xf8] %vm1465_vm14, %v1456_v24  ;;  %v3068_v24 = vld [vmem:[%s3879_s5 + $0x78] sm:$0xff]  }
 0x29a   : > { %v1458_v25 = vpop.permute.xlu0 %1457 }
 0x29b   : > { %1467 = vst.msk [vmem:[#allocation3 + $0x18] sm:$0xff] %vm350_vm5, %v1458_v25  ;;  %v1460_v45 = vpop.permute.xlu1 %1459  ;;  %vm1519_vm5 = vcmask 457728  }
 0x29c   : > { %1469 = vst.msk [vmem:[#allocation3 + $0x20] sm:$0xff] %vm1468_vm15, %v1458_v25  ;;  %v3069_v25 = vld [vmem:[%s3879_s5 + $0x38] sm:$0xff]  }
 0x29d   : > { %1471 = vst.msk [vmem:[#allocation3 + $0x30] sm:$0x1] %vm1470_vm1, %v1460_v45 }
 0x29e   : > { %1473 = vst.msk [vmem:[#allocation3 + $0x38] sm:$0x1] %vm1472_vm2, %v1460_v45 }
 0x29f   : > { %v1574_v38 = vld [vmem:[#allocation3] sm:$0xfc] }
 0x2a0   : > { %v1525_v45 = vld [vmem:[#allocation3] sm:$0xff] }
 0x2a2   : > { %v3705_v33 = vld [vmem:[#allocation3 + $0x18] sm:$0xff] }
 0x2a3   : > { %v1580_v40 = vpack.c.bf16 %v3705_v33, %v1574_v38 }
 0x2a4   : > { %v1577_v34 = vld [vmem:[#allocation3 + $0x30] sm:$0x3] }
 0x2a5   : > { %v1583_v41 = vpack.c.bf16 %v1577_v34, %v1577_v34  ;;  %v1633_v48 = vrot.slane %v1580_v40, 1  ;;  %v3075_v40 = vld [vmem:[%s3879_s5 + $0x140] sm:$0xff]  }
 0x2a7   : > { %v1634_v50 = vrot.slane %v1583_v41, 1 }
 0x2a9   : > { %v1635_v62 = vsel %vm850_vm10, %v1633_v48, %v1634_v50  ;;  %v3079_v48 = vld [vmem:[%s3879_s5 + $0x150] sm:$0xff]   ;;  %v3080_v50 = vld [vmem:[%s3879_s5 + $0x198] sm:$0xff]  }
 0x2f1   : > { %v1492_v26 = vpop.permute.xlu0 %1491 }
 0x2f2   : > { %1514 = vst.msk [vmem:[#allocation3 + $0x8] sm:$0xfe] %vm1513_vm4, %v1492_v26 }
 0x2f4   : > { %v1496_v27 = vpop.permute.xlu1 %1495 }
 0x2f5   : > { %1518 = vst.msk [vmem:[#allocation3 + $0x20] sm:$0xff] %vm1517_vm6, %v1496_v27 }
 0x2f8   : > { %v1494_v28 = vpop.permute.xlu1 %1493 }
 0x2f9   : > { %v1504_v47 = vsel %vm1503_vm7, %v1492_v26, %v1494_v28  ;;  %v1575_v39 = vld [vmem:[#allocation3 + $0x8] sm:$0xfc]  ;;  %v3070_v26 = vld [vmem:[%s3879_s5 + $0x80] sm:$0xff]   ;;  %v3071_v28 = vld [vmem:[%s3879_s5 + $0x88] sm:$0xff]  }
 0x2fa   : > { %1516 = vst.msk [vmem:[#allocation3 + $0x10] sm:$0xfe] %vm1515_vm8, %v1504_v47  ;;  %v1526_v10 = vld [vmem:[#allocation3 + $0x8] sm:$0xff]  ;;  %v3072_v47 = vld [vmem:[%s3879_s5 + $0x90] sm:$0xff]  }
 0x2fb   : > { %v2055_v34 = vld [vmem:[#allocation3 + $0x8] sm:$0xf0] }
 0x2fc   : > { %v1500_v55 = vpop.permute.xlu0 %1499  ;;  %v3707_v36 = vld [vmem:[#allocation3 + $0x20] sm:$0xff] }
 0x2fd   : > { %1522 = vst.msk [vmem:[#allocation3 + $0x38] sm:$0x7] %vm1521_vm3, %v1500_v55  ;;  %v1502_v29 = vpop.permute.xlu1 %1501  ;;  %v1581_v42 = vpack.c.bf16 %v3707_v36, %v1575_v39  ;;  %v1532_v13 = vpack.c.bf16 %v3707_v36, %v1526_v10 }
 0x2fe   : > { %v1506_v32 = vsel %vm1503_vm7, %v1500_v55, %v1502_v29 }
 0x2ff   : > { %1524 = vst.msk [vmem:[#allocation3 + $0x40] sm:$0x7] %vm1523_vm11, %v1506_v32  ;;  %v1636_v52 = vrot.slane %v1581_v42, 1  ;;  %v3073_v32 = vld [vmem:[%s3879_s5 + $0x98] sm:$0xff]  }
 0x300   : > { %v1498_v35 = vpop.permute.xlu0 %1497 }
 0x301   : > { %v1505_v37 = vsel %vm1503_vm7, %v1496_v27, %v1498_v35  ;;  %v2056_v60 = vld [vmem:[#allocation3 + $0x10] sm:$0xf0]  ;;  %v1531_v27 = vpack.c.bf16 %v3705_v33, %v1525_v45 }
 0x302   : > { %1520 = vst.msk [vmem:[#allocation3 + $0x28] sm:$0xff] %vm1519_vm5, %v1505_v37  ;;  %v1576_v3 = vld [vmem:[#allocation3 + $0x10] sm:$0xfc]  ;;  %v2061_v37 = vpack.c.bf16 %v3707_v36, %v2055_v34  ;;  %v3077_v36 = vld [vmem:[%s3879_s5 + $0x148] sm:$0xff]  }
 0x303   : > { %v3074_v35 = vld [vmem:[%s3879_s5 + $0x180] sm:$0xff]  }
 0x304   : > { %v1578_v43 = vld [vmem:[#allocation3 + $0x38] sm:$0x3]  ;;  %v1527_v39 = vld [vmem:[#allocation3 + $0x10] sm:$0xff]  ;;  %v2116_v42 = vrot.slane %v2061_v37, 2 }
 0x305   : > { %v1584_v44 = vpack.c.bf16 %v1578_v43, %v1578_v43  ;;  %v2058_v55 = vld [vmem:[#allocation3 + $0x38] sm:$0xf] }
 0x306   : > { %v2059_v51 = vld [vmem:[#allocation3 + $0x40] sm:$0xf]  ;;  %v2064_v29 = vpack.c.bf16 %v2058_v55, %v2058_v55 }
 0x307   : > { %v1637_v53 = vrot.slane %v1584_v44, 1  ;;  %v2065_v57 = vpack.c.bf16 %v2059_v51, %v2059_v51  ;;  %v1579_v4 = vld [vmem:[#allocation3 + $0x40] sm:$0x3]  ;;  %v3081_v51 = vld [vmem:[%s3879_s5 + $0x158] sm:$0xff]  }
 0x308   : > { %v1585_v61 = vpack.c.bf16 %v1579_v4, %v1579_v4  ;;  %v2117_v38 = vrot.slane %v2064_v29, 2  ;;  %v3078_v44 = vld [vmem:[%s3879_s5 + $0x190] sm:$0xff]  }
 0x309   : > { %v1638_v8 = vsel %vm850_vm10, %v1636_v52, %v1637_v53  ;;  %v3716_v59 = vld [vmem:[#allocation3 + $0x28] sm:$0xff]  ;;  %v2120_v1 = vrot.slane %v2065_v57, 2  ;;  %v3082_v52 = vld [vmem:[%s3879_s5 + $0x1a0] sm:$0xff]   ;;  %v3085_v57 = vld [vmem:[%s3879_s5 + $0x168] sm:$0xff]  }
 0x30a   : > { %1799 = vmatprep.mubr.bf16.mxu0 %v1638_v8  ;;  %v2062_v63 = vpack.c.bf16 %v3716_v59, %v2056_v60  ;;  %v1582_v31 = vpack.c.bf16 %v3716_v59, %v1576_v3  ;;  %v1640_v7 = vrot.slane %v1585_v61, 1  ;;  %v1533_v41 = vpack.c.bf16 %v3716_v59, %v1527_v39  ;;  %v3083_v53 = vld [vmem:[%s3879_s5 + $0x160] sm:$0xff]   ;;  %v3086_v8 = vld [vmem:[%s3879_s5 + $0x1b0] sm:$0xff]  }
 0x30b   : > { %1800 = vmatmul.mubr.bf16.vlgmr.msra.gmra.mrb[8].mxu0 %v1635_v62  ;;  %v2118_v43 = vsel %vm413_vm9, %v2116_v42, %v2117_v38  ;;  %v2057_v59 = vld [vmem:[#allocation3 + $0x30] sm:$0xf]  ;;  %v3087_v60 = vld [vmem:[%s3879_s5 + $0x170] sm:$0xff]   ;;  %v3088_v62 = vld [vmem:[%s3879_s5 + $0x1b8] sm:$0xff]  }
 0x30c   : > { %2836 = vmatpush3.bf16.msra.mxu0 %v3049_v56  ;;  %v2119_v0 = vrot.slane %v2062_v63, 2  ;;  %2843 = vmatprep.mubr.msk.bf16.mxu0 %vm3126_vm13, %v3604_v46  ;;  %v1639_v6 = vrot.slane %v1582_v31, 1  ;;  %v3084_v56 = vld [vmem:[%s3879_s5 + $0x1a8] sm:$0xff]   ;;  %v2054_v63 = vld [vmem:[#allocation3] sm:$0xf0] }
 0x30d   : > { %2837 = vmatprep.subr.bf16.mxu0 %v3604_v46  ;;  %v2749_v38 = vld [vmem:[%s3880_s6] ss:$0 sm:$0xff] }
 0x30e   : > { %v2121_v49 = vsel %vm413_vm9, %v2119_v0, %v2120_v1  ;;  %v1641_v12 = vsel %vm850_vm10, %v1639_v6, %v1640_v7  ;;  %v2063_v0 = vpack.c.bf16 %v2057_v59, %v2057_v59  ;;  %v3089_v1 = vld [vmem:[%s3879_s5 + $0x178] sm:$0xff]  }
 0x30f   : > { %2868 = vmatmul.mubr.msk.bf16.vlgmr.msra.gmra.mrb[20].mxu1 %vm1441_vm0, %v2121_v49 }
 0x310   : > { %2838 = vmatpush3.bf16.msra.mxu0 %v3051_v2  ;;  %v2060_v2 = vpack.c.bf16 %v3705_v33, %v2054_v63 }
 0x311   : > { %2839 = vmatprep.subr.bf16.mxu0 %v3604_v46 }
 0x312   : > { %v2113_v49 = vrot.slane %v2060_v2, 2 }
 0x314   : > { %2840 = vmatpush3.bf16.msra.mxu0 %v3052_v58  ;;  %v2114_v58 = vrot.slane %v2063_v0, 2 }
 0x315   : > { %2841 = vmatprep.subr.bf16.mxu0 %v3604_v46 }
 0x316   : > { %v2115_v3 = vsel %vm413_vm9, %v2113_v49, %v2114_v58 }
 0x318   : > { %2842 = vmatpush3.bf16.msra.mxu0 %v3053_v54 }
 0x319   : > { %2781 = vmatprep.subr.bf16.mxu0 %v3054_v5 }
 0x31b   : > { %2844 = vmatmul.mubr.msk.bf16.vlgmr.msra.gmra.mrb[12].mxu0 %vm1441_vm0, %v1641_v12 }
 0x31c   : > { %2782 = vmatpush3.bf16.msra.mxu0 %v3055_v9  ;;  %2004 = vmatprep.mubr.bf16.mxu0 %v1532_v13 }
 0x31d   : > { %2783 = vmatprep.subr.bf16.mxu0 %v3056_v11 }
 0x320   : > { %2784 = vmatpush3.bf16.msra.mxu0 %v3057_v14 }
 0x321   : > { %2785 = vmatprep.subr.bf16.mxu0 %v3058_v15 }
 0x324   : > { %2786 = vmatpush3.bf16.msra.mxu0 %v3059_v16 }
 0x325   : > { %2787 = vmatprep.subr.bf16.mxu0 %v3060_v17 }
 0x328   : > { %2788 = vmatpush3.bf16.msra.mxu0 %v3061_v18 }
 0x329   : > { %2789 = vmatprep.subr.bf16.mxu0 %v3062_v19 }
 0x32c   : > { %2790 = vmatpush3.bf16.msra.mxu0 %v3063_v20 }
 0x32d   : > { %2791 = vmatprep.subr.bf16.mxu0 %v3064_v21 }
 0x330   : > { %2792 = vmatpush3.bf16.msra.mxu0 %v3065_v22 }
 0x331   : > { %2793 = vmatprep.subr.bf16.mxu0 %v3066_v23 }
 0x334   : > { %2794 = vmatpush3.bf16.msra.mxu0 %v3067_v30 }
 0x335   : > { %2795 = vmatprep.subr.bf16.mxu0 %v3068_v24 }
 0x338   : > { %2796 = vmatpush3.bf16.msra.mxu0 %v3069_v25 }
 0x339   : > { %2847 = vmatprep.subr.bf16.mxu0 %v3604_v46 }
 0x33b   : > { %2005 = vmatmul.mubr.bf16.vlgmr.msra.gmra.mrb[16].mxu0 %v1531_v27 }
 0x33c   : > { %2848 = vmatpush3.bf16.msra.mxu0 %v3070_v26  ;;  %2855 = vmatprep.mubr.msk.bf16.mxu0 %vm3126_vm13, %v3604_v46 }
 0x33d   : > { %2849 = vmatprep.subr.bf16.mxu0 %v3604_v46 }
 0x340   : > { %2850 = vmatpush3.bf16.msra.mxu0 %v3071_v28 }
 0x341   : > { %2851 = vmatprep.subr.bf16.mxu0 %v3604_v46 }
 0x344   : > { %2852 = vmatpush3.bf16.msra.mxu0 %v3072_v47 }
 0x345   : > { %2853 = vmatprep.subr.bf16.mxu0 %v3604_v46  ;;  %v3076_v46 = vld [vmem:[%s3879_s5 + $0x188] sm:$0xff]  }
 0x348   : > { %2854 = vmatpush3.bf16.msra.mxu0 %v3073_v32 }
 0x349   : > { %2808 = vmatprep.subr.bf16.mxu0 %v3074_v35 }
 0x34b   : > { %2856 = vmatmul.mubr.msk.bf16.vlgmr.msra.gmra.mrb[20].mxu0 %vm1441_vm0, %v1533_v41 }
 0x34c   : > { %2809 = vmatpush3.bf16.msra.mxu0 %v3075_v40  ;;  %2279 = vmatprep.mubr.bf16.mxu0 %v2118_v43 }
 0x34d   : > { %2810 = vmatprep.subr.bf16.mxu0 %v3076_v46  ;;  %v3091_v46 = vld [vmem:[%s3214_s16] sm:$0xff] }
 0x350   : > { %2811 = vmatpush3.bf16.msra.mxu0 %v3077_v36 }
 0x351   : > { %2812 = vmatprep.subr.bf16.mxu0 %v3078_v44  ;;  %v3092_v44 = vld [vmem:[%s3214_s16 + $0x8] sm:$0xff] }
 0x354   : > { %2813 = vmatpush3.bf16.msra.mxu0 %v3079_v48 }
 0x355   : > { %2814 = vmatprep.subr.bf16.mxu0 %v3080_v50 }
 0x358   : > { %2815 = vmatpush3.bf16.msra.mxu0 %v3081_v51 }
 0x359   : > { %2816 = vmatprep.subr.bf16.mxu0 %v3082_v52 }
 0x35c   : > { %2817 = vmatpush3.bf16.msra.mxu0 %v3083_v53 }
 0x35d   : > { %2818 = vmatprep.subr.bf16.mxu0 %v3084_v56 }
 0x360   : > { %2819 = vmatpush3.bf16.msra.mxu0 %v3085_v57 }
 0x361   : > { %2820 = vmatprep.subr.bf16.mxu0 %v3086_v8 }
 0x364   : > { %2821 = vmatpush3.bf16.msra.mxu0 %v3087_v60 }
 0x365   : > { %2822 = vmatprep.subr.bf16.mxu0 %v3088_v62 }
 0x368   : > { %2823 = vmatpush3.bf16.msra.mxu0 %v3089_v1 }
 0x36b   : > { %2280 = vmatmul.mubr.bf16.vlgmr.msra.gmra.mrb[24].mxu0 %v2115_v3 }
 0x3de   : > { %v2770_v4 = vpop.f32.mrb[8].mxu0 }
 0x3df   : > { %v2771_v31 = vpop.f32.mrb[9].mxu0 }
 0x3e0   : > { %v2772_v54 = vadd.f32 %v2771_v31, %v2770_v4  ;;  %v2773_v61 = vpop.f32.mrb[10].mxu0 }
 0x3e1   : > { %v2774_v5 = vpop.f32.mrb[11].mxu0 }
 0x3e2   : > { %v2775_v6 = vadd.f32 %v2774_v5, %v2773_v61  ;;  %v2322_v33 = vpop.f32.mrb[20].mxu1 }
 0x3e3   : > { %v2869_v7 = vpop.f32.mrb[21].mxu1 }
 0x3e4   : > { %v2325_v9 = vpop.f32.mrb[22].mxu1 }
 0x3e5   : > { %v2870_v10 = vpop.f32.mrb[23].mxu1 }
 0x3ee   : > { %v1842_v11 = vpop.f32.mrb[12].mxu0 }
 0x3ef   : > { %v1843_v12 = vadd.f32 %v2772_v54, %v1842_v11  ;;  %v2845_v13 = vpop.f32.mrb[13].mxu0 }
 0x3f0   : > { %v1845_v14 = vpop.f32.mrb[14].mxu0 }
 0x3f1   : > { %v1846_v15 = vadd.f32 %v2775_v6, %v1845_v14  ;;  %v2846_v16 = vpop.f32.mrb[15].mxu0 }
 0x40e   : > { %v2797_v17 = vpop.f32.mrb[16].mxu0 }
 0x40f   : > { %v2798_v18 = vpop.f32.mrb[17].mxu0 }
 0x410   : > { %v2799_v19 = vadd.f32 %v2798_v18, %v2797_v17  ;;  %v2800_v20 = vpop.f32.mrb[18].mxu0 }
 0x411   : > { %v2801_v21 = vpop.f32.mrb[19].mxu0 }
 0x412   : > { %v2802_v22 = vadd.f32 %v2801_v21, %v2800_v20  ;;  %v2007_v23 = vadd.f32 %v2799_v19, %v1843_v12 }
 0x414   : > { %v2010_v30 = vadd.f32 %v2802_v22, %v1846_v15 }
 0x41e   : > { %v2047_v24 = vpop.f32.mrb[20].mxu0 }
 0x41f   : > { %v2048_v25 = vadd.f32 %v2047_v24, %v2007_v23  ;;  %v2857_v45 = vpop.f32.mrb[21].mxu0 }
 0x420   : > { %v2050_v26 = vpop.f32.mrb[22].mxu0 }
 0x421   : > { %v2051_v27 = vadd.f32 %v2050_v26, %v2010_v30  ;;  %v2858_v28 = vpop.f32.mrb[23].mxu0 }
 0x43e   : > { %v2824_v47 = vpop.f32.mrb[24].mxu0 }
 0x43f   : > { %v2825_v55 = vpop.f32.mrb[25].mxu0 }
 0x440   : > { %v2826_v29 = vadd.f32 %v2825_v55, %v2824_v47  ;;  %v2827_v32 = vpop.f32.mrb[26].mxu0 }
 0x441   : > { %v2828_v34 = vpop.f32.mrb[27].mxu0 }
 0x442   : > { %v2323_v35 = vadd.f32 %v2826_v29, %v2322_v33  ;;  %v2829_v37 = vadd.f32 %v2828_v34, %v2827_v32 }
 0x444   : > { %v2329_v39 = vadd.f32 %v2323_v35, %v2048_v25  ;;  %v2326_v40 = vadd.f32 %v2829_v37, %v2325_v9 }
 0x446   : > { %v2338_v41 = vadd.f32 %v2749_v38, %v2329_v39  ;;  %v2330_v42 = vadd.f32 %v2326_v40, %v2051_v27 }
 0x448   : > { %v2340_v43 = vadd.f32 %v3091_v46, %v2338_v41  ;;  %v2339_v36 = vadd.f32 %v2749_v38, %v2330_v42 }
 0x44a   : > { %2342 = vst [vmem:[%s319_s23] sm:$0xff] %v2340_v43  ;;  %v2341_v48 = vadd.f32 %v3092_v44, %v2339_v36 }
 0x44c   : > { %2343 = vst [vmem:[%s319_s23 + $0x8] sm:$0xff] %v2341_v48 }
 0x44d PF: > { %s19_s27 = sadd.s32 1, %s3118_s27  }
 0x44e   : > { %p16_p1 = scmp.ge.s32.totalorder %s19_s27, 4  }
 0x450   :  { %18 = sbr.rel (!%p16_p1) target bundleno = 1 (0x1), region = 93 }
 0x457   :  { %2365 = vsyncpa [#allocation5], 1 }
 0x458   :  { %2367 = vsyncpa [#allocation5 + $0x1], 1 }

</bundles_post_ra>
